<compile_context>
chip_gen: v5e
topology: v5e:2x2
jax: 0.10.0
libtpu: 0.0.40
codegen_flags: <defaults>
</compile_context>

<pallas_src>
import math

import jax
import jax.numpy as jnp
from jax.experimental import pallas as pl
from jax.experimental.pallas import tpu as pltpu

NEG_SLOPE = 0.2
BN_EPS = 1e-5
ACT_DTYPE = jnp.bfloat16   # activations / weights on the MXU; accumulation fp32


# ----------------------------------------------------------------------------
# Pallas kernel 1: KxK conv (dense or depthwise) with in-kernel tap
# accumulation + partial BatchNorm statistics emitted as a side output.
# ----------------------------------------------------------------------------
def conv2d_pallas(x, w, *, k, stride=1, depthwise=False):
    """Reflect-padded KxK conv, NHWC.

    x: (N, H, W, Cin) bf16.
    w: (k, k, Cin, Cout) bf16 (dense) or (k*k, C) bf16 (depthwise).
    Returns:
      y:     (N, Ho, Wo, Cout) bf16 conv output (pre-BN, pre-activation)
      stats: (N, Ho, 2, Cout) f32, per output row: [channel sum, channel sumsq]
             of the fp32 accumulator (partial BatchNorm statistics).
    """
    N, H, W, Cin = x.shape
    pad = k // 2
    if pad:
        x = jnp.pad(x, ((0, 0), (pad, pad), (pad, pad), (0, 0)), mode="reflect")
    Cout = w.shape[1] if depthwise else w.shape[3]

    if not depthwise and Cin < 8:
        # Zero-pad input channels so the MXU contraction dim is >= one sublane
        # (only the first RGB layer); result is unchanged.
        cpad = 8 - Cin
        x = jnp.pad(x, ((0, 0), (0, 0), (0, 0), (0, cpad)))
        w = jnp.pad(w, ((0, 0), (0, 0), (0, cpad), (0, 0)))
        Cin = 8

    _, Hp, Wp, _ = x.shape
    Ho = (Hp - k) // stride + 1
    Wo = (Wp - k) // stride + 1

    if not depthwise:
        w = w.reshape(k * k, Cin, Cout)

    # Split the padded input into `stride` column-parity planes so every tap
    # becomes a contiguous width-Wo slice inside the kernel.
    phases = [x[:, :, p::stride, :] for p in range(stride)]
    phase_w = [ph.shape[2] for ph in phases]
    n_rows = k * stride

    def kernel(*refs):
        row_refs = refs[:n_rows]
        w_ref = refs[n_rows]
        y_ref = refs[n_rows + 1]
        st_ref = refs[n_rows + 2]
        if depthwise:
            wv = w_ref[...].astype(jnp.float32)               # (k*k, C)
        acc = jnp.zeros((Wo, Cout), jnp.float32)
        for kh in range(k):
            xs = [row_refs[kh * stride + p][0, 0, :, :] for p in range(stride)]
            for kw in range(k):
                p, q = kw % stride, kw // stride
                xw = xs[p][q:q + Wo, :]                       # (Wo, Cin) bf16
                t = kh * k + kw
                if depthwise:
                    acc = acc + xw.astype(jnp.float32) * wv[t:t + 1, :]
                else:
                    acc = acc + jnp.dot(xw, w_ref[t, :, :],
                                        preferred_element_type=jnp.float32)
        y_ref[0, 0] = acc.astype(y_ref.dtype)
        st_ref[0, 0, 0:1, :] = jnp.sum(acc, axis=0, keepdims=True)
        st_ref[0, 0, 1:2, :] = jnp.sum(acc * acc, axis=0, keepdims=True)

    in_specs = []
    row_inputs = []
    for kh in range(k):
        for p in range(stride):
            in_specs.append(pl.BlockSpec(
                (1, 1, phase_w[p], Cin),
                lambda n, h, kh=kh: (n, h * stride + kh, 0, 0)))
            row_inputs.append(phases[p])
    if depthwise:
        in_specs.append(pl.BlockSpec((k * k, Cout), lambda n, h: (0, 0)))
    else:
        in_specs.append(pl.BlockSpec((k * k, Cin, Cout), lambda n, h: (0, 0, 0)))

    y, stats = pl.pallas_call(
        kernel,
        out_shape=(jax.ShapeDtypeStruct((N, Ho, Wo, Cout), ACT_DTYPE),
                   jax.ShapeDtypeStruct((N, Ho, 2, Cout), jnp.float32)),
        grid=(N, Ho),
        in_specs=in_specs,
        out_specs=(pl.BlockSpec((1, 1, Wo, Cout), lambda n, h: (n, h, 0, 0)),
                   pl.BlockSpec((1, 1, 2, Cout), lambda n, h: (n, h, 0, 0))),
        compiler_params=pltpu.CompilerParams(
            dimension_semantics=("parallel", "parallel")),
    )(*row_inputs, w)
    return y, stats


# ----------------------------------------------------------------------------
# Pallas kernel 2: fused BN-apply (scale/shift) + activation + residual,
# tiled over rows, channels on the lane axis.
# ----------------------------------------------------------------------------
def _pick_rows(m, cap=1024):
    for t in (1024, 512, 256, 128, 64, 32, 16, 8):
        if t <= cap and m % t == 0:
            return t
    return m


def bn_act_res_pallas(y2d, scale, shift, *, act="lrelu", res=None,
                      out_dtype=ACT_DTYPE):
    M, C = y2d.shape
    tm = _pick_rows(M)
    sc = scale.reshape(1, C).astype(jnp.float32)
    sh = shift.reshape(1, C).astype(jnp.float32)

    def kernel(*refs):
        if res is not None:
            y_ref, sc_ref, sh_ref, r_ref, o_ref = refs
        else:
            y_ref, sc_ref, sh_ref, o_ref = refs
        v = y_ref[...].astype(jnp.float32) * sc_ref[...] + sh_ref[...]
        if act == "lrelu":
            v = jnp.where(v >= 0, v, NEG_SLOPE * v)
        elif act == "tanh":
            v = jnp.tanh(v)
        if res is not None:
            v = v + r_ref[...].astype(jnp.float32)
        o_ref[...] = v.astype(o_ref.dtype)

    in_specs = [pl.BlockSpec((tm, C), lambda i: (i, 0)),
                pl.BlockSpec((1, C), lambda i: (0, 0)),
                pl.BlockSpec((1, C), lambda i: (0, 0))]
    inputs = [y2d, sc, sh]
    if res is not None:
        in_specs.append(pl.BlockSpec((tm, C), lambda i: (i, 0)))
        inputs.append(res)

    return pl.pallas_call(
        kernel,
        out_shape=jax.ShapeDtypeStruct((M, C), out_dtype),
        grid=(M // tm,),
        in_specs=in_specs,
        out_specs=pl.BlockSpec((tm, C), lambda i: (i, 0)),
        compiler_params=pltpu.CompilerParams(dimension_semantics=("parallel",)),
    )(*inputs)


# ----------------------------------------------------------------------------
# Layer wrappers
# ----------------------------------------------------------------------------
def conv_block(x, p, *, stride=1, bn=True, act="lrelu", res=None,
               depthwise=False, out_dtype=ACT_DTYPE):
    """conv2DBatchNormRelu equivalent: reflect-padded conv + BatchNorm(batch
    statistics, eps=1e-5) + activation (+ optional residual added after BN)."""
    y, stats = conv2d_pallas(x, p["w"], k=p["k"], stride=stride,
                             depthwise=depthwise)
    N, Ho, Wo, C = y.shape
    count = float(N * Ho * Wo)
    if bn:
        s = jnp.sum(stats[:, :, 0, :], axis=(0, 1))
        ss = jnp.sum(stats[:, :, 1, :], axis=(0, 1))
        mean = s / count
        var = jnp.maximum(ss / count - mean * mean, 0.0)
        scale = p["g"] * jax.lax.rsqrt(var + BN_EPS)
        shift = p["b"] - mean * scale
    else:
        scale = jnp.ones((C,), jnp.float32)
        shift = jnp.zeros((C,), jnp.float32)
    res2 = None if res is None else res.reshape(N * Ho * Wo, C)
    out = bn_act_res_pallas(y.reshape(N * Ho * Wo, C), scale, shift,
                            act=act, res=res2, out_dtype=out_dtype)
    return out.reshape(N, Ho, Wo, C)


def invertible_block(x, p):
    y = conv_block(x, p["pw1"])                           # 1x1 expand + BN + LReLU
    y = conv_block(y, p["dw"], depthwise=True)            # depthwise 3x3 + BN + LReLU
    res = x if x.shape[-1] == p["pw2"]["w"].shape[3] else None
    return conv_block(y, p["pw2"], act="none", res=res)   # 1x1 project + BN (+ x)


def _up_indices(n):
    i = jnp.arange(2 * n, dtype=jnp.float32)
    src = jnp.maximum((i + 0.5) / 2.0 - 0.5, 0.0)   # align_corners=False
    lo = jnp.clip(jnp.floor(src).astype(jnp.int32), 0, n - 1)
    hi = jnp.clip(lo + 1, 0, n - 1)
    w = src - lo.astype(jnp.float32)
    return lo, hi, w


def upsample2x(x):
    # TODO(synk): bilinear 2x upsample (align_corners=False) kept as JAX
    # gather/lerp glue rather than a Pallas kernel.
    lo, hi, w = _up_indices(x.shape[1])
    xf = x.astype(jnp.float32)
    xf = (jnp.take(xf, lo, axis=1) * (1.0 - w)[None, :, None, None]
          + jnp.take(xf, hi, axis=1) * w[None, :, None, None])
    lo, hi, w = _up_indices(x.shape[2])
    xf = (jnp.take(xf, lo, axis=2) * (1.0 - w)[None, None, :, None]
          + jnp.take(xf, hi, axis=2) * w[None, None, :, None])
    return xf.astype(ACT_DTYPE)


# ----------------------------------------------------------------------------
# Parameter construction (deterministic, in-script)
# ----------------------------------------------------------------------------
def build_params(key, in_channels=3, multiplier=0.25):
    cnt = [0]

    def nk():
        cnt[0] += 1
        return jax.random.fold_in(key, cnt[0])

    def r(c):
        return int(round(c * multiplier))

    def conv_p(k, cin, cout, with_bn=True):
        w = (jax.random.normal(nk(), (k, k, cin, cout), jnp.float32)
             / math.sqrt(k * k * cin)).astype(ACT_DTYPE)
        p = dict(w=w, k=k)
        if with_bn:
            p["g"] = jnp.ones((cout,), jnp.float32)   # BN gamma init
            p["b"] = jnp.zeros((cout,), jnp.float32)  # BN beta init
        return p

    def dw_p(c):
        w = (jax.random.normal(nk(), (3 * 3, c), jnp.float32) / 3.0).astype(ACT_DTYPE)
        return dict(w=w, k=3,
                    g=jnp.ones((c,), jnp.float32), b=jnp.zeros((c,), jnp.float32))

    def inv_p(cin, cout, expansion=2):
        mid = int(round(expansion * cin))
        return dict(pw1=conv_p(1, cin, mid), dw=dw_p(mid), pw2=conv_p(1, mid, cout))

    c32, c64, c128, c256 = r(32), r(64), r(128), r(256)
    return dict(
        A=[conv_p(7, in_channels, c32), conv_p(3, c32, c64), conv_p(3, c64, c64)],
        B=[conv_p(3, c64, c128), conv_p(3, c128, c128)],
        C_pre=conv_p(3, c128, c128),
        C_inv=[inv_p(c128, c256), inv_p(c256, c256),
               inv_p(c256, c256), inv_p(c256, c256)],
        C_post=conv_p(3, c256, c128),
        D=[conv_p(3, c128, c128), conv_p(3, c128, c128)],
        E=[conv_p(3, c128, c64), conv_p(3, c64, c64), conv_p(7, c64, c32)],
        out=conv_p(1, c32, in_channels, with_bn=False),
    )


# ----------------------------------------------------------------------------
# Full AnimeGAN forward (NCHW in / NCHW out, like the PyTorch module)
# ----------------------------------------------------------------------------
def animegan_forward(x_nchw, params):
    x = jnp.transpose(x_nchw, (0, 2, 3, 1)).astype(ACT_DTYPE)   # NCHW -> NHWC

    # A block
    x = conv_block(x, params["A"][0])
    x = conv_block(x, params["A"][1], stride=2)
    x = conv_block(x, params["A"][2])
    # B block
    x = conv_block(x, params["B"][0], stride=2)
    x = conv_block(x, params["B"][1])
    # C block
    x = conv_block(x, params["C_pre"])
    for ip in params["C_inv"]:
        x = invertible_block(x, ip)
    x = conv_block(x, params["C_post"])
    # D block
    x = upsample2x(x)
    x = conv_block(x, params["D"][0])
    x = conv_block(x, params["D"][1])
    # E block
    x = upsample2x(x)
    x = conv_block(x, params["E"][0])
    x = conv_block(x, params["E"][1])
    x = conv_block(x, params["E"][2])
    # out: 1x1 conv + tanh (no BN)
    x = conv_block(x, params["out"], bn=False, act="tanh", out_dtype=jnp.float32)

    return jnp.transpose(x, (0, 3, 1, 2))   # NHWC -> NCHW


if __name__ == "__main__":
    key = jax.random.PRNGKey(0)
    # multiplier=0.25 shrinks channel widths (32/64/128/256 -> 8/16/32/64) so the
    # small test runs fast; the architecture / dataflow is identical.
    params = build_params(key, in_channels=3, multiplier=0.25)
    x = jax.random.normal(jax.random.fold_in(key, 999), (2, 3, 16, 16), jnp.float32)

    y = animegan_forward(x, params)
    y = jax.block_until_ready(y)

    assert y.shape == (2, 3, 16, 16), y.shape
    assert bool(jnp.all(jnp.isfinite(y)))
    assert bool(jnp.all(jnp.abs(y) <= 1.0 + 1e-6))   # tanh output range
    print("KERNEL_OK")
</pallas_src>

<mosaic_0001>
module attributes {stable_mosaic.version = 11 : i64} {
  func.func @kernel(%arg0: i32, %arg1: i32, %arg2: memref<1x1x22x8xbf16, #tpu.memory_space<vmem>>, %arg3: memref<1x1x22x8xbf16, #tpu.memory_space<vmem>>, %arg4: memref<1x1x22x8xbf16, #tpu.memory_space<vmem>>, %arg5: memref<1x1x22x8xbf16, #tpu.memory_space<vmem>>, %arg6: memref<1x1x22x8xbf16, #tpu.memory_space<vmem>>, %arg7: memref<1x1x22x8xbf16, #tpu.memory_space<vmem>>, %arg8: memref<1x1x22x8xbf16, #tpu.memory_space<vmem>>, %arg9: memref<49x8x8xbf16, #tpu.memory_space<vmem>>, %arg10: memref<1x1x16x8xbf16, #tpu.memory_space<vmem>>, %arg11: memref<1x1x2x8xf32, #tpu.memory_space<vmem>>) attributes {dimension_semantics = [#tpu.dimension_semantics<parallel>, #tpu.dimension_semantics<parallel>], iteration_bounds = array<i64: 2, 16>, scalar_prefetch = 0 : i64, scratch_operands = 0 : i64, tpu.core_type = #tpu.core_type<tc>, window_params = [{transform_indices = @transform_0, window_bounds = array<i64: 1, 1, 22, 8>}, {transform_indices = @transform_1, window_bounds = array<i64: 1, 1, 22, 8>}, {transform_indices = @transform_2, window_bounds = array<i64: 1, 1, 22, 8>}, {transform_indices = @transform_3, window_bounds = array<i64: 1, 1, 22, 8>}, {transform_indices = @transform_4, window_bounds = array<i64: 1, 1, 22, 8>}, {transform_indices = @transform_5, window_bounds = array<i64: 1, 1, 22, 8>}, {transform_indices = @transform_6, window_bounds = array<i64: 1, 1, 22, 8>}, {pipeline_mode = #tpu.pipeline_mode<synchronous>, transform_indices = @transform_7, window_bounds = array<i64: 49, 8, 8>}, {transform_indices = @transform_8, window_bounds = array<i64: 1, 1, 16, 8>}, {transform_indices = @transform_9, window_bounds = array<i64: 1, 1, 2, 8>}]} {
    %cst = arith.constant 0.000000e+00 : f32
    %0 = vector.broadcast %cst : f32 to vector<16x8xf32>
    %c0 = arith.constant 0 : index
    %c0_0 = arith.constant 0 : index
    %c0_1 = arith.constant 0 : index
    %c0_2 = arith.constant 0 : index
    %1 = vector.load %arg2[%c0, %c0_0, %c0_1, %c0_2] : memref<1x1x22x8xbf16, #tpu.memory_space<vmem>>, vector<1x1x22x8xbf16>
    %2 = vector.shape_cast %1 : vector<1x1x22x8xbf16> to vector<22x8xbf16>
    %3 = vector.extract_strided_slice %2 {offsets = [0, 0], sizes = [16, 8], strides = [1, 1]} : vector<22x8xbf16> to vector<16x8xbf16>
    %c0_3 = arith.constant 0 : index
    %c0_4 = arith.constant 0 : index
    %c0_5 = arith.constant 0 : index
    %4 = vector.load %arg9[%c0_3, %c0_4, %c0_5] : memref<49x8x8xbf16, #tpu.memory_space<vmem>>, vector<1x8x8xbf16>
    %5 = vector.shape_cast %4 : vector<1x8x8xbf16> to vector<8x8xbf16>
    %cst_6 = arith.constant dense<0.000000e+00> : vector<16x8xf32>
    %6 = tpu.matmul %3, %5, %cst_6 {dimension_numbers = #tpu.dot_dimension_numbers<[1], [0], [0], [1], [0, 0, 1, 1], [], []>} : vector<16x8xbf16>, vector<8x8xbf16>, vector<16x8xf32> -> vector<16x8xf32>
    %7 = arith.addf %0, %6 : vector<16x8xf32>
    %8 = vector.extract_strided_slice %2 {offsets = [1, 0], sizes = [16, 8], strides = [1, 1]} : vector<22x8xbf16> to vector<16x8xbf16>
    %c1 = arith.constant 1 : index
    %c0_7 = arith.constant 0 : index
    %c0_8 = arith.constant 0 : index
    %9 = vector.load %arg9[%c1, %c0_7, %c0_8] : memref<49x8x8xbf16, #tpu.memory_space<vmem>>, vector<1x8x8xbf16>
    %10 = vector.shape_cast %9 : vector<1x8x8xbf16> to vector<8x8xbf16>
    %cst_9 = arith.constant dense<0.000000e+00> : vector<16x8xf32>
    %11 = tpu.matmul %8, %10, %cst_9 {dimension_numbers = #tpu.dot_dimension_numbers<[1], [0], [0], [1], [0, 0, 1, 1], [], []>} : vector<16x8xbf16>, vector<8x8xbf16>, vector<16x8xf32> -> vector<16x8xf32>
    %12 = arith.addf %7, %11 : vector<16x8xf32>
    %13 = vector.extract_strided_slice %2 {offsets = [2, 0], sizes = [16, 8], strides = [1, 1]} : vector<22x8xbf16> to vector<16x8xbf16>
    %c2 = arith.constant 2 : index
    %c0_10 = arith.constant 0 : index
    %c0_11 = arith.constant 0 : index
    %14 = vector.load %arg9[%c2, %c0_10, %c0_11] : memref<49x8x8xbf16, #tpu.memory_space<vmem>>, vector<1x8x8xbf16>
    %15 = vector.shape_cast %14 : vector<1x8x8xbf16> to vector<8x8xbf16>
    %cst_12 = arith.constant dense<0.000000e+00> : vector<16x8xf32>
    %16 = tpu.matmul %13, %15, %cst_12 {dimension_numbers = #tpu.dot_dimension_numbers<[1], [0], [0], [1], [0, 0, 1, 1], [], []>} : vector<16x8xbf16>, vector<8x8xbf16>, vector<16x8xf32> -> vector<16x8xf32>
    %17 = arith.addf %12, %16 : vector<16x8xf32>
    %18 = vector.extract_strided_slice %2 {offsets = [3, 0], sizes = [16, 8], strides = [1, 1]} : vector<22x8xbf16> to vector<16x8xbf16>
    %c3 = arith.constant 3 : index
    %c0_13 = arith.constant 0 : index
    %c0_14 = arith.constant 0 : index
    %19 = vector.load %arg9[%c3, %c0_13, %c0_14] : memref<49x8x8xbf16, #tpu.memory_space<vmem>>, vector<1x8x8xbf16>
    %20 = vector.shape_cast %19 : vector<1x8x8xbf16> to vector<8x8xbf16>
    %cst_15 = arith.constant dense<0.000000e+00> : vector<16x8xf32>
    %21 = tpu.matmul %18, %20, %cst_15 {dimension_numbers = #tpu.dot_dimension_numbers<[1], [0], [0], [1], [0, 0, 1, 1], [], []>} : vector<16x8xbf16>, vector<8x8xbf16>, vector<16x8xf32> -> vector<16x8xf32>
    %22 = arith.addf %17, %21 : vector<16x8xf32>
    %23 = vector.extract_strided_slice %2 {offsets = [4, 0], sizes = [16, 8], strides = [1, 1]} : vector<22x8xbf16> to vector<16x8xbf16>
    %c4 = arith.constant 4 : index
    %c0_16 = arith.constant 0 : index
    %c0_17 = arith.constant 0 : index
    %24 = vector.load %arg9[%c4, %c0_16, %c0_17] : memref<49x8x8xbf16, #tpu.memory_space<vmem>>, vector<1x8x8xbf16>
    %25 = vector.shape_cast %24 : vector<1x8x8xbf16> to vector<8x8xbf16>
    %cst_18 = arith.constant dense<0.000000e+00> : vector<16x8xf32>
    %26 = tpu.matmul %23, %25, %cst_18 {dimension_numbers = #tpu.dot_dimension_numbers<[1], [0], [0], [1], [0, 0, 1, 1], [], []>} : vector<16x8xbf16>, vector<8x8xbf16>, vector<16x8xf32> -> vector<16x8xf32>
    %27 = arith.addf %22, %26 : vector<16x8xf32>
    %28 = vector.extract_strided_slice %2 {offsets = [5, 0], sizes = [16, 8], strides = [1, 1]} : vector<22x8xbf16> to vector<16x8xbf16>
    %c5 = arith.constant 5 : index
    %c0_19 = arith.constant 0 : index
    %c0_20 = arith.constant 0 : index
    %29 = vector.load %arg9[%c5, %c0_19, %c0_20] : memref<49x8x8xbf16, #tpu.memory_space<vmem>>, vector<1x8x8xbf16>
    %30 = vector.shape_cast %29 : vector<1x8x8xbf16> to vector<8x8xbf16>
    %cst_21 = arith.constant dense<0.000000e+00> : vector<16x8xf32>
    %31 = tpu.matmul %28, %30, %cst_21 {dimension_numbers = #tpu.dot_dimension_numbers<[1], [0], [0], [1], [0, 0, 1, 1], [], []>} : vector<16x8xbf16>, vector<8x8xbf16>, vector<16x8xf32> -> vector<16x8xf32>
    %32 = arith.addf %27, %31 : vector<16x8xf32>
    %33 = vector.extract_strided_slice %2 {offsets = [6, 0], sizes = [16, 8], strides = [1, 1]} : vector<22x8xbf16> to vector<16x8xbf16>
    %c6 = arith.constant 6 : index
    %c0_22 = arith.constant 0 : index
    %c0_23 = arith.constant 0 : index
    %34 = vector.load %arg9[%c6, %c0_22, %c0_23] : memref<49x8x8xbf16, #tpu.memory_space<vmem>>, vector<1x8x8xbf16>
    %35 = vector.shape_cast %34 : vector<1x8x8xbf16> to vector<8x8xbf16>
    %cst_24 = arith.constant dense<0.000000e+00> : vector<16x8xf32>
    %36 = tpu.matmul %33, %35, %cst_24 {dimension_numbers = #tpu.dot_dimension_numbers<[1], [0], [0], [1], [0, 0, 1, 1], [], []>} : vector<16x8xbf16>, vector<8x8xbf16>, vector<16x8xf32> -> vector<16x8xf32>
    %37 = arith.addf %32, %36 : vector<16x8xf32>
    %c0_25 = arith.constant 0 : index
    %c0_26 = arith.constant 0 : index
    %c0_27 = arith.constant 0 : index
    %c0_28 = arith.constant 0 : index
    %38 = vector.load %arg3[%c0_25, %c0_26, %c0_27, %c0_28] : memref<1x1x22x8xbf16, #tpu.memory_space<vmem>>, vector<1x1x22x8xbf16>
    %39 = vector.shape_cast %38 : vector<1x1x22x8xbf16> to vector<22x8xbf16>
    %40 = vector.extract_strided_slice %39 {offsets = [0, 0], sizes = [16, 8], strides = [1, 1]} : vector<22x8xbf16> to vector<16x8xbf16>
    %c7 = arith.constant 7 : index
    %c0_29 = arith.constant 0 : index
    %c0_30 = arith.constant 0 : index
    %41 = vector.load %arg9[%c7, %c0_29, %c0_30] : memref<49x8x8xbf16, #tpu.memory_space<vmem>>, vector<1x8x8xbf16>
    %42 = vector.shape_cast %41 : vector<1x8x8xbf16> to vector<8x8xbf16>
    %cst_31 = arith.constant dense<0.000000e+00> : vector<16x8xf32>
    %43 = tpu.matmul %40, %42, %cst_31 {dimension_numbers = #tpu.dot_dimension_numbers<[1], [0], [0], [1], [0, 0, 1, 1], [], []>} : vector<16x8xbf16>, vector<8x8xbf16>, vector<16x8xf32> -> vector<16x8xf32>
    %44 = arith.addf %37, %43 : vector<16x8xf32>
    %45 = vector.extract_strided_slice %39 {offsets = [1, 0], sizes = [16, 8], strides = [1, 1]} : vector<22x8xbf16> to vector<16x8xbf16>
    %c8 = arith.constant 8 : index
    %c0_32 = arith.constant 0 : index
    %c0_33 = arith.constant 0 : index
    %46 = vector.load %arg9[%c8, %c0_32, %c0_33] : memref<49x8x8xbf16, #tpu.memory_space<vmem>>, vector<1x8x8xbf16>
    %47 = vector.shape_cast %46 : vector<1x8x8xbf16> to vector<8x8xbf16>
    %cst_34 = arith.constant dense<0.000000e+00> : vector<16x8xf32>
    %48 = tpu.matmul %45, %47, %cst_34 {dimension_numbers = #tpu.dot_dimension_numbers<[1], [0], [0], [1], [0, 0, 1, 1], [], []>} : vector<16x8xbf16>, vector<8x8xbf16>, vector<16x8xf32> -> vector<16x8xf32>
    %49 = arith.addf %44, %48 : vector<16x8xf32>
    %50 = vector.extract_strided_slice %39 {offsets = [2, 0], sizes = [16, 8], strides = [1, 1]} : vector<22x8xbf16> to vector<16x8xbf16>
    %c9 = arith.constant 9 : index
    %c0_35 = arith.constant 0 : index
    %c0_36 = arith.constant 0 : index
    %51 = vector.load %arg9[%c9, %c0_35, %c0_36] : memref<49x8x8xbf16, #tpu.memory_space<vmem>>, vector<1x8x8xbf16>
    %52 = vector.shape_cast %51 : vector<1x8x8xbf16> to vector<8x8xbf16>
    %cst_37 = arith.constant dense<0.000000e+00> : vector<16x8xf32>
    %53 = tpu.matmul %50, %52, %cst_37 {dimension_numbers = #tpu.dot_dimension_numbers<[1], [0], [0], [1], [0, 0, 1, 1], [], []>} : vector<16x8xbf16>, vector<8x8xbf16>, vector<16x8xf32> -> vector<16x8xf32>
    %54 = arith.addf %49, %53 : vector<16x8xf32>
    %55 = vector.extract_strided_slice %39 {offsets = [3, 0], sizes = [16, 8], strides = [1, 1]} : vector<22x8xbf16> to vector<16x8xbf16>
    %c10 = arith.constant 10 : index
    %c0_38 = arith.constant 0 : index
    %c0_39 = arith.constant 0 : index
    %56 = vector.load %arg9[%c10, %c0_38, %c0_39] : memref<49x8x8xbf16, #tpu.memory_space<vmem>>, vector<1x8x8xbf16>
    %57 = vector.shape_cast %56 : vector<1x8x8xbf16> to vector<8x8xbf16>
    %cst_40 = arith.constant dense<0.000000e+00> : vector<16x8xf32>
    %58 = tpu.matmul %55, %57, %cst_40 {dimension_numbers = #tpu.dot_dimension_numbers<[1], [0], [0], [1], [0, 0, 1, 1], [], []>} : vector<16x8xbf16>, vector<8x8xbf16>, vector<16x8xf32> -> vector<16x8xf32>
    %59 = arith.addf %54, %58 : vector<16x8xf32>
    %60 = vector.extract_strided_slice %39 {offsets = [4, 0], sizes = [16, 8], strides = [1, 1]} : vector<22x8xbf16> to vector<16x8xbf16>
    %c11 = arith.constant 11 : index
    %c0_41 = arith.constant 0 : index
    %c0_42 = arith.constant 0 : index
    %61 = vector.load %arg9[%c11, %c0_41, %c0_42] : memref<49x8x8xbf16, #tpu.memory_space<vmem>>, vector<1x8x8xbf16>
    %62 = vector.shape_cast %61 : vector<1x8x8xbf16> to vector<8x8xbf16>
    %cst_43 = arith.constant dense<0.000000e+00> : vector<16x8xf32>
    %63 = tpu.matmul %60, %62, %cst_43 {dimension_numbers = #tpu.dot_dimension_numbers<[1], [0], [0], [1], [0, 0, 1, 1], [], []>} : vector<16x8xbf16>, vector<8x8xbf16>, vector<16x8xf32> -> vector<16x8xf32>
    %64 = arith.addf %59, %63 : vector<16x8xf32>
    %65 = vector.extract_strided_slice %39 {offsets = [5, 0], sizes = [16, 8], strides = [1, 1]} : vector<22x8xbf16> to vector<16x8xbf16>
    %c12 = arith.constant 12 : index
    %c0_44 = arith.constant 0 : index
    %c0_45 = arith.constant 0 : index
    %66 = vector.load %arg9[%c12, %c0_44, %c0_45] : memref<49x8x8xbf16, #tpu.memory_space<vmem>>, vector<1x8x8xbf16>
    %67 = vector.shape_cast %66 : vector<1x8x8xbf16> to vector<8x8xbf16>
    %cst_46 = arith.constant dense<0.000000e+00> : vector<16x8xf32>
    %68 = tpu.matmul %65, %67, %cst_46 {dimension_numbers = #tpu.dot_dimension_numbers<[1], [0], [0], [1], [0, 0, 1, 1], [], []>} : vector<16x8xbf16>, vector<8x8xbf16>, vector<16x8xf32> -> vector<16x8xf32>
    %69 = arith.addf %64, %68 : vector<16x8xf32>
    %70 = vector.extract_strided_slice %39 {offsets = [6, 0], sizes = [16, 8], strides = [1, 1]} : vector<22x8xbf16> to vector<16x8xbf16>
    %c13 = arith.constant 13 : index
    %c0_47 = arith.constant 0 : index
    %c0_48 = arith.constant 0 : index
    %71 = vector.load %arg9[%c13, %c0_47, %c0_48] : memref<49x8x8xbf16, #tpu.memory_space<vmem>>, vector<1x8x8xbf16>
    %72 = vector.shape_cast %71 : vector<1x8x8xbf16> to vector<8x8xbf16>
    %cst_49 = arith.constant dense<0.000000e+00> : vector<16x8xf32>
    %73 = tpu.matmul %70, %72, %cst_49 {dimension_numbers = #tpu.dot_dimension_numbers<[1], [0], [0], [1], [0, 0, 1, 1], [], []>} : vector<16x8xbf16>, vector<8x8xbf16>, vector<16x8xf32> -> vector<16x8xf32>
    %74 = arith.addf %69, %73 : vector<16x8xf32>
    %c0_50 = arith.constant 0 : index
    %c0_51 = arith.constant 0 : index
    %c0_52 = arith.constant 0 : index
    %c0_53 = arith.constant 0 : index
    %75 = vector.load %arg4[%c0_50, %c0_51, %c0_52, %c0_53] : memref<1x1x22x8xbf16, #tpu.memory_space<vmem>>, vector<1x1x22x8xbf16>
    %76 = vector.shape_cast %75 : vector<1x1x22x8xbf16> to vector<22x8xbf16>
    %77 = vector.extract_strided_slice %76 {offsets = [0, 0], sizes = [16, 8], strides = [1, 1]} : vector<22x8xbf16> to vector<16x8xbf16>
    %c14 = arith.constant 14 : index
    %c0_54 = arith.constant 0 : index
    %c0_55 = arith.constant 0 : index
    %78 = vector.load %arg9[%c14, %c0_54, %c0_55] : memref<49x8x8xbf16, #tpu.memory_space<vmem>>, vector<1x8x8xbf16>
    %79 = vector.shape_cast %78 : vector<1x8x8xbf16> to vector<8x8xbf16>
    %cst_56 = arith.constant dense<0.000000e+00> : vector<16x8xf32>
    %80 = tpu.matmul %77, %79, %cst_56 {dimension_numbers = #tpu.dot_dimension_numbers<[1], [0], [0], [1], [0, 0, 1, 1], [], []>} : vector<16x8xbf16>, vector<8x8xbf16>, vector<16x8xf32> -> vector<16x8xf32>
    %81 = arith.addf %74, %80 : vector<16x8xf32>
    %82 = vector.extract_strided_slice %76 {offsets = [1, 0], sizes = [16, 8], strides = [1, 1]} : vector<22x8xbf16> to vector<16x8xbf16>
    %c15 = arith.constant 15 : index
    %c0_57 = arith.constant 0 : index
    %c0_58 = arith.constant 0 : index
    %83 = vector.load %arg9[%c15, %c0_57, %c0_58] : memref<49x8x8xbf16, #tpu.memory_space<vmem>>, vector<1x8x8xbf16>
    %84 = vector.shape_cast %83 : vector<1x8x8xbf16> to vector<8x8xbf16>
    %cst_59 = arith.constant dense<0.000000e+00> : vector<16x8xf32>
    %85 = tpu.matmul %82, %84, %cst_59 {dimension_numbers = #tpu.dot_dimension_numbers<[1], [0], [0], [1], [0, 0, 1, 1], [], []>} : vector<16x8xbf16>, vector<8x8xbf16>, vector<16x8xf32> -> vector<16x8xf32>
    %86 = arith.addf %81, %85 : vector<16x8xf32>
    %87 = vector.extract_strided_slice %76 {offsets = [2, 0], sizes = [16, 8], strides = [1, 1]} : vector<22x8xbf16> to vector<16x8xbf16>
    %c16 = arith.constant 16 : index
    %c0_60 = arith.constant 0 : index
    %c0_61 = arith.constant 0 : index
    %88 = vector.load %arg9[%c16, %c0_60, %c0_61] : memref<49x8x8xbf16, #tpu.memory_space<vmem>>, vector<1x8x8xbf16>
    %89 = vector.shape_cast %88 : vector<1x8x8xbf16> to vector<8x8xbf16>
    %cst_62 = arith.constant dense<0.000000e+00> : vector<16x8xf32>
    %90 = tpu.matmul %87, %89, %cst_62 {dimension_numbers = #tpu.dot_dimension_numbers<[1], [0], [0], [1], [0, 0, 1, 1], [], []>} : vector<16x8xbf16>, vector<8x8xbf16>, vector<16x8xf32> -> vector<16x8xf32>
    %91 = arith.addf %86, %90 : vector<16x8xf32>
    %92 = vector.extract_strided_slice %76 {offsets = [3, 0], sizes = [16, 8], strides = [1, 1]} : vector<22x8xbf16> to vector<16x8xbf16>
    %c17 = arith.constant 17 : index
    %c0_63 = arith.constant 0 : index
    %c0_64 = arith.constant 0 : index
    %93 = vector.load %arg9[%c17, %c0_63, %c0_64] : memref<49x8x8xbf16, #tpu.memory_space<vmem>>, vector<1x8x8xbf16>
    %94 = vector.shape_cast %93 : vector<1x8x8xbf16> to vector<8x8xbf16>
    %cst_65 = arith.constant dense<0.000000e+00> : vector<16x8xf32>
    %95 = tpu.matmul %92, %94, %cst_65 {dimension_numbers = #tpu.dot_dimension_numbers<[1], [0], [0], [1], [0, 0, 1, 1], [], []>} : vector<16x8xbf16>, vector<8x8xbf16>, vector<16x8xf32> -> vector<16x8xf32>
    %96 = arith.addf %91, %95 : vector<16x8xf32>
    %97 = vector.extract_strided_slice %76 {offsets = [4, 0], sizes = [16, 8], strides = [1, 1]} : vector<22x8xbf16> to vector<16x8xbf16>
    %c18 = arith.constant 18 : index
    %c0_66 = arith.constant 0 : index
    %c0_67 = arith.constant 0 : index
    %98 = vector.load %arg9[%c18, %c0_66, %c0_67] : memref<49x8x8xbf16, #tpu.memory_space<vmem>>, vector<1x8x8xbf16>
    %99 = vector.shape_cast %98 : vector<1x8x8xbf16> to vector<8x8xbf16>
    %cst_68 = arith.constant dense<0.000000e+00> : vector<16x8xf32>
    %100 = tpu.matmul %97, %99, %cst_68 {dimension_numbers = #tpu.dot_dimension_numbers<[1], [0], [0], [1], [0, 0, 1, 1], [], []>} : vector<16x8xbf16>, vector<8x8xbf16>, vector<16x8xf32> -> vector<16x8xf32>
    %101 = arith.addf %96, %100 : vector<16x8xf32>
    %102 = vector.extract_strided_slice %76 {offsets = [5, 0], sizes = [16, 8], strides = [1, 1]} : vector<22x8xbf16> to vector<16x8xbf16>
    %c19 = arith.constant 19 : index
    %c0_69 = arith.constant 0 : index
    %c0_70 = arith.constant 0 : index
    %103 = vector.load %arg9[%c19, %c0_69, %c0_70] : memref<49x8x8xbf16, #tpu.memory_space<vmem>>, vector<1x8x8xbf16>
    %104 = vector.shape_cast %103 : vector<1x8x8xbf16> to vector<8x8xbf16>
    %cst_71 = arith.constant dense<0.000000e+00> : vector<16x8xf32>
    %105 = tpu.matmul %102, %104, %cst_71 {dimension_numbers = #tpu.dot_dimension_numbers<[1], [0], [0], [1], [0, 0, 1, 1], [], []>} : vector<16x8xbf16>, vector<8x8xbf16>, vector<16x8xf32> -> vector<16x8xf32>
    %106 = arith.addf %101, %105 : vector<16x8xf32>
    %107 = vector.extract_strided_slice %76 {offsets = [6, 0], sizes = [16, 8], strides = [1, 1]} : vector<22x8xbf16> to vector<16x8xbf16>
    %c20 = arith.constant 20 : index
    %c0_72 = arith.constant 0 : index
    %c0_73 = arith.constant 0 : index
    %108 = vector.load %arg9[%c20, %c0_72, %c0_73] : memref<49x8x8xbf16, #tpu.memory_space<vmem>>, vector<1x8x8xbf16>
    %109 = vector.shape_cast %108 : vector<1x8x8xbf16> to vector<8x8xbf16>
    %cst_74 = arith.constant dense<0.000000e+00> : vector<16x8xf32>
    %110 = tpu.matmul %107, %109, %cst_74 {dimension_numbers = #tpu.dot_dimension_numbers<[1], [0], [0], [1], [0, 0, 1, 1], [], []>} : vector<16x8xbf16>, vector<8x8xbf16>, vector<16x8xf32> -> vector<16x8xf32>
    %111 = arith.addf %106, %110 : vector<16x8xf32>
    %c0_75 = arith.constant 0 : index
    %c0_76 = arith.constant 0 : index
    %c0_77 = arith.constant 0 : index
    %c0_78 = arith.constant 0 : index
    %112 = vector.load %arg5[%c0_75, %c0_76, %c0_77, %c0_78] : memref<1x1x22x8xbf16, #tpu.memory_space<vmem>>, vector<1x1x22x8xbf16>
    %113 = vector.shape_cast %112 : vector<1x1x22x8xbf16> to vector<22x8xbf16>
    %114 = vector.extract_strided_slice %113 {offsets = [0, 0], sizes = [16, 8], strides = [1, 1]} : vector<22x8xbf16> to vector<16x8xbf16>
    %c21 = arith.constant 21 : index
    %c0_79 = arith.constant 0 : index
    %c0_80 = arith.constant 0 : index
    %115 = vector.load %arg9[%c21, %c0_79, %c0_80] : memref<49x8x8xbf16, #tpu.memory_space<vmem>>, vector<1x8x8xbf16>
    %116 = vector.shape_cast %115 : vector<1x8x8xbf16> to vector<8x8xbf16>
    %cst_81 = arith.constant dense<0.000000e+00> : vector<16x8xf32>
    %117 = tpu.matmul %114, %116, %cst_81 {dimension_numbers = #tpu.dot_dimension_numbers<[1], [0], [0], [1], [0, 0, 1, 1], [], []>} : vector<16x8xbf16>, vector<8x8xbf16>, vector<16x8xf32> -> vector<16x8xf32>
    %118 = arith.addf %111, %117 : vector<16x8xf32>
    %119 = vector.extract_strided_slice %113 {offsets = [1, 0], sizes = [16, 8], strides = [1, 1]} : vector<22x8xbf16> to vector<16x8xbf16>
    %c22 = arith.constant 22 : index
    %c0_82 = arith.constant 0 : index
    %c0_83 = arith.constant 0 : index
    %120 = vector.load %arg9[%c22, %c0_82, %c0_83] : memref<49x8x8xbf16, #tpu.memory_space<vmem>>, vector<1x8x8xbf16>
    %121 = vector.shape_cast %120 : vector<1x8x8xbf16> to vector<8x8xbf16>
    %cst_84 = arith.constant dense<0.000000e+00> : vector<16x8xf32>
    %122 = tpu.matmul %119, %121, %cst_84 {dimension_numbers = #tpu.dot_dimension_numbers<[1], [0], [0], [1], [0, 0, 1, 1], [], []>} : vector<16x8xbf16>, vector<8x8xbf16>, vector<16x8xf32> -> vector<16x8xf32>
    %123 = arith.addf %118, %122 : vector<16x8xf32>
    %124 = vector.extract_strided_slice %113 {offsets = [2, 0], sizes = [16, 8], strides = [1, 1]} : vector<22x8xbf16> to vector<16x8xbf16>
    %c23 = arith.constant 23 : index
    %c0_85 = arith.constant 0 : index
    %c0_86 = arith.constant 0 : index
    %125 = vector.load %arg9[%c23, %c0_85, %c0_86] : memref<49x8x8xbf16, #tpu.memory_space<vmem>>, vector<1x8x8xbf16>
    %126 = vector.shape_cast %125 : vector<1x8x8xbf16> to vector<8x8xbf16>
    %cst_87 = arith.constant dense<0.000000e+00> : vector<16x8xf32>
    %127 = tpu.matmul %124, %126, %cst_87 {dimension_numbers = #tpu.dot_dimension_numbers<[1], [0], [0], [1], [0, 0, 1, 1], [], []>} : vector<16x8xbf16>, vector<8x8xbf16>, vector<16x8xf32> -> vector<16x8xf32>
    %128 = arith.addf %123, %127 : vector<16x8xf32>
    %129 = vector.extract_strided_slice %113 {offsets = [3, 0], sizes = [16, 8], strides = [1, 1]} : vector<22x8xbf16> to vector<16x8xbf16>
    %c24 = arith.constant 24 : index
    %c0_88 = arith.constant 0 : index
    %c0_89 = arith.constant 0 : index
    %130 = vector.load %arg9[%c24, %c0_88, %c0_89] : memref<49x8x8xbf16, #tpu.memory_space<vmem>>, vector<1x8x8xbf16>
    %131 = vector.shape_cast %130 : vector<1x8x8xbf16> to vector<8x8xbf16>
    %cst_90 = arith.constant dense<0.000000e+00> : vector<16x8xf32>
    %132 = tpu.matmul %129, %131, %cst_90 {dimension_numbers = #tpu.dot_dimension_numbers<[1], [0], [0], [1], [0, 0, 1, 1], [], []>} : vector<16x8xbf16>, vector<8x8xbf16>, vector<16x8xf32> -> vector<16x8xf32>
    %133 = arith.addf %128, %132 : vector<16x8xf32>
    %134 = vector.extract_strided_slice %113 {offsets = [4, 0], sizes = [16, 8], strides = [1, 1]} : vector<22x8xbf16> to vector<16x8xbf16>
    %c25 = arith.constant 25 : index
    %c0_91 = arith.constant 0 : index
    %c0_92 = arith.constant 0 : index
    %135 = vector.load %arg9[%c25, %c0_91, %c0_92] : memref<49x8x8xbf16, #tpu.memory_space<vmem>>, vector<1x8x8xbf16>
    %136 = vector.shape_cast %135 : vector<1x8x8xbf16> to vector<8x8xbf16>
    %cst_93 = arith.constant dense<0.000000e+00> : vector<16x8xf32>
    %137 = tpu.matmul %134, %136, %cst_93 {dimension_numbers = #tpu.dot_dimension_numbers<[1], [0], [0], [1], [0, 0, 1, 1], [], []>} : vector<16x8xbf16>, vector<8x8xbf16>, vector<16x8xf32> -> vector<16x8xf32>
    %138 = arith.addf %133, %137 : vector<16x8xf32>
    %139 = vector.extract_strided_slice %113 {offsets = [5, 0], sizes = [16, 8], strides = [1, 1]} : vector<22x8xbf16> to vector<16x8xbf16>
    %c26 = arith.constant 26 : index
    %c0_94 = arith.constant 0 : index
    %c0_95 = arith.constant 0 : index
    %140 = vector.load %arg9[%c26, %c0_94, %c0_95] : memref<49x8x8xbf16, #tpu.memory_space<vmem>>, vector<1x8x8xbf16>
    %141 = vector.shape_cast %140 : vector<1x8x8xbf16> to vector<8x8xbf16>
    %cst_96 = arith.constant dense<0.000000e+00> : vector<16x8xf32>
    %142 = tpu.matmul %139, %141, %cst_96 {dimension_numbers = #tpu.dot_dimension_numbers<[1], [0], [0], [1], [0, 0, 1, 1], [], []>} : vector<16x8xbf16>, vector<8x8xbf16>, vector<16x8xf32> -> vector<16x8xf32>
    %143 = arith.addf %138, %142 : vector<16x8xf32>
    %144 = vector.extract_strided_slice %113 {offsets = [6, 0], sizes = [16, 8], strides = [1, 1]} : vector<22x8xbf16> to vector<16x8xbf16>
    %c27 = arith.constant 27 : index
    %c0_97 = arith.constant 0 : index
    %c0_98 = arith.constant 0 : index
    %145 = vector.load %arg9[%c27, %c0_97, %c0_98] : memref<49x8x8xbf16, #tpu.memory_space<vmem>>, vector<1x8x8xbf16>
    %146 = vector.shape_cast %145 : vector<1x8x8xbf16> to vector<8x8xbf16>
    %cst_99 = arith.constant dense<0.000000e+00> : vector<16x8xf32>
    %147 = tpu.matmul %144, %146, %cst_99 {dimension_numbers = #tpu.dot_dimension_numbers<[1], [0], [0], [1], [0, 0, 1, 1], [], []>} : vector<16x8xbf16>, vector<8x8xbf16>, vector<16x8xf32> -> vector<16x8xf32>
    %148 = arith.addf %143, %147 : vector<16x8xf32>
    %c0_100 = arith.constant 0 : index
    %c0_101 = arith.constant 0 : index
    %c0_102 = arith.constant 0 : index
    %c0_103 = arith.constant 0 : index
    %149 = vector.load %arg6[%c0_100, %c0_101, %c0_102, %c0_103] : memref<1x1x22x8xbf16, #tpu.memory_space<vmem>>, vector<1x1x22x8xbf16>
    %150 = vector.shape_cast %149 : vector<1x1x22x8xbf16> to vector<22x8xbf16>
    %151 = vector.extract_strided_slice %150 {offsets = [0, 0], sizes = [16, 8], strides = [1, 1]} : vector<22x8xbf16> to vector<16x8xbf16>
    %c28 = arith.constant 28 : index
    %c0_104 = arith.constant 0 : index
    %c0_105 = arith.constant 0 : index
    %152 = vector.load %arg9[%c28, %c0_104, %c0_105] : memref<49x8x8xbf16, #tpu.memory_space<vmem>>, vector<1x8x8xbf16>
    %153 = vector.shape_cast %152 : vector<1x8x8xbf16> to vector<8x8xbf16>
    %cst_106 = arith.constant dense<0.000000e+00> : vector<16x8xf32>
    %154 = tpu.matmul %151, %153, %cst_106 {dimension_numbers = #tpu.dot_dimension_numbers<[1], [0], [0], [1], [0, 0, 1, 1], [], []>} : vector<16x8xbf16>, vector<8x8xbf16>, vector<16x8xf32> -> vector<16x8xf32>
    %155 = arith.addf %148, %154 : vector<16x8xf32>
    %156 = vector.extract_strided_slice %150 {offsets = [1, 0], sizes = [16, 8], strides = [1, 1]} : vector<22x8xbf16> to vector<16x8xbf16>
    %c29 = arith.constant 29 : index
    %c0_107 = arith.constant 0 : index
    %c0_108 = arith.constant 0 : index
    %157 = vector.load %arg9[%c29, %c0_107, %c0_108] : memref<49x8x8xbf16, #tpu.memory_space<vmem>>, vector<1x8x8xbf16>
    %158 = vector.shape_cast %157 : vector<1x8x8xbf16> to vector<8x8xbf16>
    %cst_109 = arith.constant dense<0.000000e+00> : vector<16x8xf32>
    %159 = tpu.matmul %156, %158, %cst_109 {dimension_numbers = #tpu.dot_dimension_numbers<[1], [0], [0], [1], [0, 0, 1, 1], [], []>} : vector<16x8xbf16>, vector<8x8xbf16>, vector<16x8xf32> -> vector<16x8xf32>
    %160 = arith.addf %155, %159 : vector<16x8xf32>
    %161 = vector.extract_strided_slice %150 {offsets = [2, 0], sizes = [16, 8], strides = [1, 1]} : vector<22x8xbf16> to vector<16x8xbf16>
    %c30 = arith.constant 30 : index
    %c0_110 = arith.constant 0 : index
    %c0_111 = arith.constant 0 : index
    %162 = vector.load %arg9[%c30, %c0_110, %c0_111] : memref<49x8x8xbf16, #tpu.memory_space<vmem>>, vector<1x8x8xbf16>
    %163 = vector.shape_cast %162 : vector<1x8x8xbf16> to vector<8x8xbf16>
    %cst_112 = arith.constant dense<0.000000e+00> : vector<16x8xf32>
    %164 = tpu.matmul %161, %163, %cst_112 {dimension_numbers = #tpu.dot_dimension_numbers<[1], [0], [0], [1], [0, 0, 1, 1], [], []>} : vector<16x8xbf16>, vector<8x8xbf16>, vector<16x8xf32> -> vector<16x8xf32>
    %165 = arith.addf %160, %164 : vector<16x8xf32>
    %166 = vector.extract_strided_slice %150 {offsets = [3, 0], sizes = [16, 8], strides = [1, 1]} : vector<22x8xbf16> to vector<16x8xbf16>
    %c31 = arith.constant 31 : index
    %c0_113 = arith.constant 0 : index
    %c0_114 = arith.constant 0 : index
    %167 = vector.load %arg9[%c31, %c0_113, %c0_114] : memref<49x8x8xbf16, #tpu.memory_space<vmem>>, vector<1x8x8xbf16>
    %168 = vector.shape_cast %167 : vector<1x8x8xbf16> to vector<8x8xbf16>
    %cst_115 = arith.constant dense<0.000000e+00> : vector<16x8xf32>
    %169 = tpu.matmul %166, %168, %cst_115 {dimension_numbers = #tpu.dot_dimension_numbers<[1], [0], [0], [1], [0, 0, 1, 1], [], []>} : vector<16x8xbf16>, vector<8x8xbf16>, vector<16x8xf32> -> vector<16x8xf32>
    %170 = arith.addf %165, %169 : vector<16x8xf32>
    %171 = vector.extract_strided_slice %150 {offsets = [4, 0], sizes = [16, 8], strides = [1, 1]} : vector<22x8xbf16> to vector<16x8xbf16>
    %c32 = arith.constant 32 : index
    %c0_116 = arith.constant 0 : index
    %c0_117 = arith.constant 0 : index
    %172 = vector.load %arg9[%c32, %c0_116, %c0_117] : memref<49x8x8xbf16, #tpu.memory_space<vmem>>, vector<1x8x8xbf16>
    %173 = vector.shape_cast %172 : vector<1x8x8xbf16> to vector<8x8xbf16>
    %cst_118 = arith.constant dense<0.000000e+00> : vector<16x8xf32>
    %174 = tpu.matmul %171, %173, %cst_118 {dimension_numbers = #tpu.dot_dimension_numbers<[1], [0], [0], [1], [0, 0, 1, 1], [], []>} : vector<16x8xbf16>, vector<8x8xbf16>, vector<16x8xf32> -> vector<16x8xf32>
    %175 = arith.addf %170, %174 : vector<16x8xf32>
    %176 = vector.extract_strided_slice %150 {offsets = [5, 0], sizes = [16, 8], strides = [1, 1]} : vector<22x8xbf16> to vector<16x8xbf16>
    %c33 = arith.constant 33 : index
    %c0_119 = arith.constant 0 : index
    %c0_120 = arith.constant 0 : index
    %177 = vector.load %arg9[%c33, %c0_119, %c0_120] : memref<49x8x8xbf16, #tpu.memory_space<vmem>>, vector<1x8x8xbf16>
    %178 = vector.shape_cast %177 : vector<1x8x8xbf16> to vector<8x8xbf16>
    %cst_121 = arith.constant dense<0.000000e+00> : vector<16x8xf32>
    %179 = tpu.matmul %176, %178, %cst_121 {dimension_numbers = #tpu.dot_dimension_numbers<[1], [0], [0], [1], [0, 0, 1, 1], [], []>} : vector<16x8xbf16>, vector<8x8xbf16>, vector<16x8xf32> -> vector<16x8xf32>
    %180 = arith.addf %175, %179 : vector<16x8xf32>
    %181 = vector.extract_strided_slice %150 {offsets = [6, 0], sizes = [16, 8], strides = [1, 1]} : vector<22x8xbf16> to vector<16x8xbf16>
    %c34 = arith.constant 34 : index
    %c0_122 = arith.constant 0 : index
    %c0_123 = arith.constant 0 : index
    %182 = vector.load %arg9[%c34, %c0_122, %c0_123] : memref<49x8x8xbf16, #tpu.memory_space<vmem>>, vector<1x8x8xbf16>
    %183 = vector.shape_cast %182 : vector<1x8x8xbf16> to vector<8x8xbf16>
    %cst_124 = arith.constant dense<0.000000e+00> : vector<16x8xf32>
    %184 = tpu.matmul %181, %183, %cst_124 {dimension_numbers = #tpu.dot_dimension_numbers<[1], [0], [0], [1], [0, 0, 1, 1], [], []>} : vector<16x8xbf16>, vector<8x8xbf16>, vector<16x8xf32> -> vector<16x8xf32>
    %185 = arith.addf %180, %184 : vector<16x8xf32>
    %c0_125 = arith.constant 0 : index
    %c0_126 = arith.constant 0 : index
    %c0_127 = arith.constant 0 : index
    %c0_128 = arith.constant 0 : index
    %186 = vector.load %arg7[%c0_125, %c0_126, %c0_127, %c0_128] : memref<1x1x22x8xbf16, #tpu.memory_space<vmem>>, vector<1x1x22x8xbf16>
    %187 = vector.shape_cast %186 : vector<1x1x22x8xbf16> to vector<22x8xbf16>
    %188 = vector.extract_strided_slice %187 {offsets = [0, 0], sizes = [16, 8], strides = [1, 1]} : vector<22x8xbf16> to vector<16x8xbf16>
    %c35 = arith.constant 35 : index
    %c0_129 = arith.constant 0 : index
    %c0_130 = arith.constant 0 : index
    %189 = vector.load %arg9[%c35, %c0_129, %c0_130] : memref<49x8x8xbf16, #tpu.memory_space<vmem>>, vector<1x8x8xbf16>
    %190 = vector.shape_cast %189 : vector<1x8x8xbf16> to vector<8x8xbf16>
    %cst_131 = arith.constant dense<0.000000e+00> : vector<16x8xf32>
    %191 = tpu.matmul %188, %190, %cst_131 {dimension_numbers = #tpu.dot_dimension_numbers<[1], [0], [0], [1], [0, 0, 1, 1], [], []>} : vector<16x8xbf16>, vector<8x8xbf16>, vector<16x8xf32> -> vector<16x8xf32>
    %192 = arith.addf %185, %191 : vector<16x8xf32>
    %193 = vector.extract_strided_slice %187 {offsets = [1, 0], sizes = [16, 8], strides = [1, 1]} : vector<22x8xbf16> to vector<16x8xbf16>
    %c36 = arith.constant 36 : index
    %c0_132 = arith.constant 0 : index
    %c0_133 = arith.constant 0 : index
    %194 = vector.load %arg9[%c36, %c0_132, %c0_133] : memref<49x8x8xbf16, #tpu.memory_space<vmem>>, vector<1x8x8xbf16>
    %195 = vector.shape_cast %194 : vector<1x8x8xbf16> to vector<8x8xbf16>
    %cst_134 = arith.constant dense<0.000000e+00> : vector<16x8xf32>
    %196 = tpu.matmul %193, %195, %cst_134 {dimension_numbers = #tpu.dot_dimension_numbers<[1], [0], [0], [1], [0, 0, 1, 1], [], []>} : vector<16x8xbf16>, vector<8x8xbf16>, vector<16x8xf32> -> vector<16x8xf32>
    %197 = arith.addf %192, %196 : vector<16x8xf32>
    %198 = vector.extract_strided_slice %187 {offsets = [2, 0], sizes = [16, 8], strides = [1, 1]} : vector<22x8xbf16> to vector<16x8xbf16>
    %c37 = arith.constant 37 : index
    %c0_135 = arith.constant 0 : index
    %c0_136 = arith.constant 0 : index
    %199 = vector.load %arg9[%c37, %c0_135, %c0_136] : memref<49x8x8xbf16, #tpu.memory_space<vmem>>, vector<1x8x8xbf16>
    %200 = vector.shape_cast %199 : vector<1x8x8xbf16> to vector<8x8xbf16>
    %cst_137 = arith.constant dense<0.000000e+00> : vector<16x8xf32>
    %201 = tpu.matmul %198, %200, %cst_137 {dimension_numbers = #tpu.dot_dimension_numbers<[1], [0], [0], [1], [0, 0, 1, 1], [], []>} : vector<16x8xbf16>, vector<8x8xbf16>, vector<16x8xf32> -> vector<16x8xf32>
    %202 = arith.addf %197, %201 : vector<16x8xf32>
    %203 = vector.extract_strided_slice %187 {offsets = [3, 0], sizes = [16, 8], strides = [1, 1]} : vector<22x8xbf16> to vector<16x8xbf16>
    %c38 = arith.constant 38 : index
    %c0_138 = arith.constant 0 : index
    %c0_139 = arith.constant 0 : index
    %204 = vector.load %arg9[%c38, %c0_138, %c0_139] : memref<49x8x8xbf16, #tpu.memory_space<vmem>>, vector<1x8x8xbf16>
    %205 = vector.shape_cast %204 : vector<1x8x8xbf16> to vector<8x8xbf16>
    %cst_140 = arith.constant dense<0.000000e+00> : vector<16x8xf32>
    %206 = tpu.matmul %203, %205, %cst_140 {dimension_numbers = #tpu.dot_dimension_numbers<[1], [0], [0], [1], [0, 0, 1, 1], [], []>} : vector<16x8xbf16>, vector<8x8xbf16>, vector<16x8xf32> -> vector<16x8xf32>
    %207 = arith.addf %202, %206 : vector<16x8xf32>
    %208 = vector.extract_strided_slice %187 {offsets = [4, 0], sizes = [16, 8], strides = [1, 1]} : vector<22x8xbf16> to vector<16x8xbf16>
    %c39 = arith.constant 39 : index
    %c0_141 = arith.constant 0 : index
    %c0_142 = arith.constant 0 : index
    %209 = vector.load %arg9[%c39, %c0_141, %c0_142] : memref<49x8x8xbf16, #tpu.memory_space<vmem>>, vector<1x8x8xbf16>
    %210 = vector.shape_cast %209 : vector<1x8x8xbf16> to vector<8x8xbf16>
    %cst_143 = arith.constant dense<0.000000e+00> : vector<16x8xf32>
    %211 = tpu.matmul %208, %210, %cst_143 {dimension_numbers = #tpu.dot_dimension_numbers<[1], [0], [0], [1], [0, 0, 1, 1], [], []>} : vector<16x8xbf16>, vector<8x8xbf16>, vector<16x8xf32> -> vector<16x8xf32>
    %212 = arith.addf %207, %211 : vector<16x8xf32>
    %213 = vector.extract_strided_slice %187 {offsets = [5, 0], sizes = [16, 8], strides = [1, 1]} : vector<22x8xbf16> to vector<16x8xbf16>
    %c40 = arith.constant 40 : index
    %c0_144 = arith.constant 0 : index
    %c0_145 = arith.constant 0 : index
    %214 = vector.load %arg9[%c40, %c0_144, %c0_145] : memref<49x8x8xbf16, #tpu.memory_space<vmem>>, vector<1x8x8xbf16>
    %215 = vector.shape_cast %214 : vector<1x8x8xbf16> to vector<8x8xbf16>
    %cst_146 = arith.constant dense<0.000000e+00> : vector<16x8xf32>
    %216 = tpu.matmul %213, %215, %cst_146 {dimension_numbers = #tpu.dot_dimension_numbers<[1], [0], [0], [1], [0, 0, 1, 1], [], []>} : vector<16x8xbf16>, vector<8x8xbf16>, vector<16x8xf32> -> vector<16x8xf32>
    %217 = arith.addf %212, %216 : vector<16x8xf32>
    %218 = vector.extract_strided_slice %187 {offsets = [6, 0], sizes = [16, 8], strides = [1, 1]} : vector<22x8xbf16> to vector<16x8xbf16>
    %c41 = arith.constant 41 : index
    %c0_147 = arith.constant 0 : index
    %c0_148 = arith.constant 0 : index
    %219 = vector.load %arg9[%c41, %c0_147, %c0_148] : memref<49x8x8xbf16, #tpu.memory_space<vmem>>, vector<1x8x8xbf16>
    %220 = vector.shape_cast %219 : vector<1x8x8xbf16> to vector<8x8xbf16>
    %cst_149 = arith.constant dense<0.000000e+00> : vector<16x8xf32>
    %221 = tpu.matmul %218, %220, %cst_149 {dimension_numbers = #tpu.dot_dimension_numbers<[1], [0], [0], [1], [0, 0, 1, 1], [], []>} : vector<16x8xbf16>, vector<8x8xbf16>, vector<16x8xf32> -> vector<16x8xf32>
    %222 = arith.addf %217, %221 : vector<16x8xf32>
    %c0_150 = arith.constant 0 : index
    %c0_151 = arith.constant 0 : index
    %c0_152 = arith.constant 0 : index
    %c0_153 = arith.constant 0 : index
    %223 = vector.load %arg8[%c0_150, %c0_151, %c0_152, %c0_153] : memref<1x1x22x8xbf16, #tpu.memory_space<vmem>>, vector<1x1x22x8xbf16>
    %224 = vector.shape_cast %223 : vector<1x1x22x8xbf16> to vector<22x8xbf16>
    %225 = vector.extract_strided_slice %224 {offsets = [0, 0], sizes = [16, 8], strides = [1, 1]} : vector<22x8xbf16> to vector<16x8xbf16>
    %c42 = arith.constant 42 : index
    %c0_154 = arith.constant 0 : index
    %c0_155 = arith.constant 0 : index
    %226 = vector.load %arg9[%c42, %c0_154, %c0_155] : memref<49x8x8xbf16, #tpu.memory_space<vmem>>, vector<1x8x8xbf16>
    %227 = vector.shape_cast %226 : vector<1x8x8xbf16> to vector<8x8xbf16>
    %cst_156 = arith.constant dense<0.000000e+00> : vector<16x8xf32>
    %228 = tpu.matmul %225, %227, %cst_156 {dimension_numbers = #tpu.dot_dimension_numbers<[1], [0], [0], [1], [0, 0, 1, 1], [], []>} : vector<16x8xbf16>, vector<8x8xbf16>, vector<16x8xf32> -> vector<16x8xf32>
    %229 = arith.addf %222, %228 : vector<16x8xf32>
    %230 = vector.extract_strided_slice %224 {offsets = [1, 0], sizes = [16, 8], strides = [1, 1]} : vector<22x8xbf16> to vector<16x8xbf16>
    %c43 = arith.constant 43 : index
    %c0_157 = arith.constant 0 : index
    %c0_158 = arith.constant 0 : index
    %231 = vector.load %arg9[%c43, %c0_157, %c0_158] : memref<49x8x8xbf16, #tpu.memory_space<vmem>>, vector<1x8x8xbf16>
    %232 = vector.shape_cast %231 : vector<1x8x8xbf16> to vector<8x8xbf16>
    %cst_159 = arith.constant dense<0.000000e+00> : vector<16x8xf32>
    %233 = tpu.matmul %230, %232, %cst_159 {dimension_numbers = #tpu.dot_dimension_numbers<[1], [0], [0], [1], [0, 0, 1, 1], [], []>} : vector<16x8xbf16>, vector<8x8xbf16>, vector<16x8xf32> -> vector<16x8xf32>
    %234 = arith.addf %229, %233 : vector<16x8xf32>
    %235 = vector.extract_strided_slice %224 {offsets = [2, 0], sizes = [16, 8], strides = [1, 1]} : vector<22x8xbf16> to vector<16x8xbf16>
    %c44 = arith.constant 44 : index
    %c0_160 = arith.constant 0 : index
    %c0_161 = arith.constant 0 : index
    %236 = vector.load %arg9[%c44, %c0_160, %c0_161] : memref<49x8x8xbf16, #tpu.memory_space<vmem>>, vector<1x8x8xbf16>
    %237 = vector.shape_cast %236 : vector<1x8x8xbf16> to vector<8x8xbf16>
    %cst_162 = arith.constant dense<0.000000e+00> : vector<16x8xf32>
    %238 = tpu.matmul %235, %237, %cst_162 {dimension_numbers = #tpu.dot_dimension_numbers<[1], [0], [0], [1], [0, 0, 1, 1], [], []>} : vector<16x8xbf16>, vector<8x8xbf16>, vector<16x8xf32> -> vector<16x8xf32>
    %239 = arith.addf %234, %238 : vector<16x8xf32>
    %240 = vector.extract_strided_slice %224 {offsets = [3, 0], sizes = [16, 8], strides = [1, 1]} : vector<22x8xbf16> to vector<16x8xbf16>
    %c45 = arith.constant 45 : index
    %c0_163 = arith.constant 0 : index
    %c0_164 = arith.constant 0 : index
    %241 = vector.load %arg9[%c45, %c0_163, %c0_164] : memref<49x8x8xbf16, #tpu.memory_space<vmem>>, vector<1x8x8xbf16>
    %242 = vector.shape_cast %241 : vector<1x8x8xbf16> to vector<8x8xbf16>
    %cst_165 = arith.constant dense<0.000000e+00> : vector<16x8xf32>
    %243 = tpu.matmul %240, %242, %cst_165 {dimension_numbers = #tpu.dot_dimension_numbers<[1], [0], [0], [1], [0, 0, 1, 1], [], []>} : vector<16x8xbf16>, vector<8x8xbf16>, vector<16x8xf32> -> vector<16x8xf32>
    %244 = arith.addf %239, %243 : vector<16x8xf32>
    %245 = vector.extract_strided_slice %224 {offsets = [4, 0], sizes = [16, 8], strides = [1, 1]} : vector<22x8xbf16> to vector<16x8xbf16>
    %c46 = arith.constant 46 : index
    %c0_166 = arith.constant 0 : index
    %c0_167 = arith.constant 0 : index
    %246 = vector.load %arg9[%c46, %c0_166, %c0_167] : memref<49x8x8xbf16, #tpu.memory_space<vmem>>, vector<1x8x8xbf16>
    %247 = vector.shape_cast %246 : vector<1x8x8xbf16> to vector<8x8xbf16>
    %cst_168 = arith.constant dense<0.000000e+00> : vector<16x8xf32>
    %248 = tpu.matmul %245, %247, %cst_168 {dimension_numbers = #tpu.dot_dimension_numbers<[1], [0], [0], [1], [0, 0, 1, 1], [], []>} : vector<16x8xbf16>, vector<8x8xbf16>, vector<16x8xf32> -> vector<16x8xf32>
    %249 = arith.addf %244, %248 : vector<16x8xf32>
    %250 = vector.extract_strided_slice %224 {offsets = [5, 0], sizes = [16, 8], strides = [1, 1]} : vector<22x8xbf16> to vector<16x8xbf16>
    %c47 = arith.constant 47 : index
    %c0_169 = arith.constant 0 : index
    %c0_170 = arith.constant 0 : index
    %251 = vector.load %arg9[%c47, %c0_169, %c0_170] : memref<49x8x8xbf16, #tpu.memory_space<vmem>>, vector<1x8x8xbf16>
    %252 = vector.shape_cast %251 : vector<1x8x8xbf16> to vector<8x8xbf16>
    %cst_171 = arith.constant dense<0.000000e+00> : vector<16x8xf32>
    %253 = tpu.matmul %250, %252, %cst_171 {dimension_numbers = #tpu.dot_dimension_numbers<[1], [0], [0], [1], [0, 0, 1, 1], [], []>} : vector<16x8xbf16>, vector<8x8xbf16>, vector<16x8xf32> -> vector<16x8xf32>
    %254 = arith.addf %249, %253 : vector<16x8xf32>
    %255 = vector.extract_strided_slice %224 {offsets = [6, 0], sizes = [16, 8], strides = [1, 1]} : vector<22x8xbf16> to vector<16x8xbf16>
    %c48 = arith.constant 48 : index
    %c0_172 = arith.constant 0 : index
    %c0_173 = arith.constant 0 : index
    %256 = vector.load %arg9[%c48, %c0_172, %c0_173] : memref<49x8x8xbf16, #tpu.memory_space<vmem>>, vector<1x8x8xbf16>
    %257 = vector.shape_cast %256 : vector<1x8x8xbf16> to vector<8x8xbf16>
    %cst_174 = arith.constant dense<0.000000e+00> : vector<16x8xf32>
    %258 = tpu.matmul %255, %257, %cst_174 {dimension_numbers = #tpu.dot_dimension_numbers<[1], [0], [0], [1], [0, 0, 1, 1], [], []>} : vector<16x8xbf16>, vector<8x8xbf16>, vector<16x8xf32> -> vector<16x8xf32>
    %259 = arith.addf %254, %258 : vector<16x8xf32>
    %260 = arith.truncf %259 : vector<16x8xf32> to vector<16x8xbf16>
    %c0_175 = arith.constant 0 : index
    %c0_176 = arith.constant 0 : index
    %c0_177 = arith.constant 0 : index
    %c0_178 = arith.constant 0 : index
    %261 = vector.load %arg10[%c0_175, %c0_176, %c0_177, %c0_178] : memref<1x1x16x8xbf16, #tpu.memory_space<vmem>>, vector<1x1x16x8xbf16>
    %262 = vector.shape_cast %261 : vector<1x1x16x8xbf16> to vector<16x8xbf16>
    %263 = vector.shape_cast %260 : vector<16x8xbf16> to vector<1x1x16x8xbf16>
    tpu.vector_store %arg10[%c0_175, %c0_176, %c0_177, %c0_178], %263 {strides = array<i32>} : memref<1x1x16x8xbf16, #tpu.memory_space<vmem>>, vector<1x1x16x8xbf16>,
    %cst_179 = arith.constant dense<0.000000e+00> : vector<8xf32>
    %264 = vector.multi_reduction <add>, %259, %cst_179 [0] : vector<16x8xf32> to vector<8xf32>
    %265 = vector.shape_cast %264 : vector<8xf32> to vector<1x8xf32>
    %c0_180 = arith.constant 0 : index
    %c0_181 = arith.constant 0 : index
    %c0_182 = arith.constant 0 : index
    %c0_183 = arith.constant 0 : index
    %266 = vector.load %arg11[%c0_180, %c0_181, %c0_182, %c0_183] : memref<1x1x2x8xf32, #tpu.memory_space<vmem>>, vector<1x1x1x8xf32>
    %267 = vector.shape_cast %266 : vector<1x1x1x8xf32> to vector<1x8xf32>
    %268 = vector.shape_cast %265 : vector<1x8xf32> to vector<1x1x1x8xf32>
    tpu.vector_store %arg11[%c0_180, %c0_181, %c0_182, %c0_183], %268 {strides = array<i32>} : memref<1x1x2x8xf32, #tpu.memory_space<vmem>>, vector<1x1x1x8xf32>,
    %269 = arith.mulf %259, %259 : vector<16x8xf32>
    %cst_184 = arith.constant dense<0.000000e+00> : vector<8xf32>
    %270 = vector.multi_reduction <add>, %269, %cst_184 [0] : vector<16x8xf32> to vector<8xf32>
    %271 = vector.shape_cast %270 : vector<8xf32> to vector<1x8xf32>
    %c0_185 = arith.constant 0 : index
    %c0_186 = arith.constant 0 : index
    %c1_187 = arith.constant 1 : index
    %c0_188 = arith.constant 0 : index
    %272 = vector.load %arg11[%c0_185, %c0_186, %c1_187, %c0_188] : memref<1x1x2x8xf32, #tpu.memory_space<vmem>>, vector<1x1x1x8xf32>
    %273 = vector.shape_cast %272 : vector<1x1x1x8xf32> to vector<1x8xf32>
    %274 = vector.shape_cast %271 : vector<1x8xf32> to vector<1x1x1x8xf32>
    tpu.vector_store %arg11[%c0_185, %c0_186, %c1_187, %c0_188], %274 {strides = array<i32>} : memref<1x1x2x8xf32, #tpu.memory_space<vmem>>, vector<1x1x1x8xf32>,
    return
  }
  func.func @transform_0(%arg0: i32, %arg1: i32) -> (i32, i32, i32, i32) {
    %c1_i32 = arith.constant 1 : i32
    %0 = arith.muli %arg1, %c1_i32 : i32
    %c0_i32 = arith.constant 0 : i32
    %1 = arith.addi %0, %c0_i32 : i32
    %c0_i32_0 = arith.constant 0 : i32
    %c0_i32_1 = arith.constant 0 : i32
    %c0_i32_2 = arith.constant 0 : i32
    return %arg0, %1, %c0_i32_0, %c0_i32_1 : i32, i32, i32, i32
  }
  func.func @transform_1(%arg0: i32, %arg1: i32) -> (i32, i32, i32, i32) {
    %c1_i32 = arith.constant 1 : i32
    %0 = arith.muli %arg1, %c1_i32 : i32
    %c1_i32_0 = arith.constant 1 : i32
    %1 = arith.addi %0, %c1_i32_0 : i32
    %c0_i32 = arith.constant 0 : i32
    %c0_i32_1 = arith.constant 0 : i32
    %c0_i32_2 = arith.constant 0 : i32
    return %arg0, %1, %c0_i32, %c0_i32_1 : i32, i32, i32, i32
  }
  func.func @transform_2(%arg0: i32, %arg1: i32) -> (i32, i32, i32, i32) {
    %c1_i32 = arith.constant 1 : i32
    %0 = arith.muli %arg1, %c1_i32 : i32
    %c2_i32 = arith.constant 2 : i32
    %1 = arith.addi %0, %c2_i32 : i32
    %c0_i32 = arith.constant 0 : i32
    %c0_i32_0 = arith.constant 0 : i32
    %c0_i32_1 = arith.constant 0 : i32
    return %arg0, %1, %c0_i32, %c0_i32_0 : i32, i32, i32, i32
  }
  func.func @transform_3(%arg0: i32, %arg1: i32) -> (i32, i32, i32, i32) {
    %c1_i32 = arith.constant 1 : i32
    %0 = arith.muli %arg1, %c1_i32 : i32
    %c3_i32 = arith.constant 3 : i32
    %1 = arith.addi %0, %c3_i32 : i32
    %c0_i32 = arith.constant 0 : i32
    %c0_i32_0 = arith.constant 0 : i32
    %c0_i32_1 = arith.constant 0 : i32
    return %arg0, %1, %c0_i32, %c0_i32_0 : i32, i32, i32, i32
  }
  func.func @transform_4(%arg0: i32, %arg1: i32) -> (i32, i32, i32, i32) {
    %c1_i32 = arith.constant 1 : i32
    %0 = arith.muli %arg1, %c1_i32 : i32
    %c4_i32 = arith.constant 4 : i32
    %1 = arith.addi %0, %c4_i32 : i32
    %c0_i32 = arith.constant 0 : i32
    %c0_i32_0 = arith.constant 0 : i32
    %c0_i32_1 = arith.constant 0 : i32
    return %arg0, %1, %c0_i32, %c0_i32_0 : i32, i32, i32, i32
  }
  func.func @transform_5(%arg0: i32, %arg1: i32) -> (i32, i32, i32, i32) {
    %c1_i32 = arith.constant 1 : i32
    %0 = arith.muli %arg1, %c1_i32 : i32
    %c5_i32 = arith.constant 5 : i32
    %1 = arith.addi %0, %c5_i32 : i32
    %c0_i32 = arith.constant 0 : i32
    %c0_i32_0 = arith.constant 0 : i32
    %c0_i32_1 = arith.constant 0 : i32
    return %arg0, %1, %c0_i32, %c0_i32_0 : i32, i32, i32, i32
  }
  func.func @transform_6(%arg0: i32, %arg1: i32) -> (i32, i32, i32, i32) {
    %c1_i32 = arith.constant 1 : i32
    %0 = arith.muli %arg1, %c1_i32 : i32
    %c6_i32 = arith.constant 6 : i32
    %1 = arith.addi %0, %c6_i32 : i32
    %c0_i32 = arith.constant 0 : i32
    %c0_i32_0 = arith.constant 0 : i32
    %c0_i32_1 = arith.constant 0 : i32
    return %arg0, %1, %c0_i32, %c0_i32_0 : i32, i32, i32, i32
  }
  func.func @transform_7(%arg0: i32, %arg1: i32) -> (i32, i32, i32) {
    %c0_i32 = arith.constant 0 : i32
    %c0_i32_0 = arith.constant 0 : i32
    %c0_i32_1 = arith.constant 0 : i32
    %c0_i32_2 = arith.constant 0 : i32
    return %c0_i32, %c0_i32_0, %c0_i32_1 : i32, i32, i32
  }
  func.func @transform_8(%arg0: i32, %arg1: i32) -> (i32, i32, i32, i32) {
    %c0_i32 = arith.constant 0 : i32
    %c0_i32_0 = arith.constant 0 : i32
    %c0_i32_1 = arith.constant 0 : i32
    return %arg0, %arg1, %c0_i32, %c0_i32_0 : i32, i32, i32, i32
  }
  func.func @transform_9(%arg0: i32, %arg1: i32) -> (i32, i32, i32, i32) {
    %c0_i32 = arith.constant 0 : i32
    %c0_i32_0 = arith.constant 0 : i32
    %c0_i32_1 = arith.constant 0 : i32
    return %arg0, %arg1, %c0_i32, %c0_i32_0 : i32, i32, i32, i32
  }
}

</mosaic_0001>

<bundles_post_ra>
// kernel: tpu_custom_call.1
= control target key start
LH: loop header
LB: loop body
LE: loop exit
PB: predicated region body
PF: predicated region fallthrough
CT: control target
= control target key end

     0   :  { %s2730_s30 = smov 0   ;;  %s2732_s10 = smov 0   ;;  %s3273_s0 = inlined_call_operand.vmem [shape: bf16[2,22,22,8], index: 0, kind: input, shape index: {}]   ;;  %s3274_s1 = inlined_call_operand.vmem [shape: bf16[2,22,22,8], index: 1, kind: input, shape index: {}]   ;;  %s3275_s2 = inlined_call_operand.vmem [shape: bf16[2,22,22,8], index: 2, kind: input, shape index: {}]   ;;  %s3276_s3 = inlined_call_operand.vmem [shape: bf16[2,22,22,8], index: 3, kind: input, shape index: {}]   ;;  %s3277_s4 = inlined_call_operand.vmem [shape: bf16[2,22,22,8], index: 4, kind: input, shape index: {}]   ;;  %s3278_s5 = inlined_call_operand.vmem [shape: bf16[2,22,22,8], index: 5, kind: input, shape index: {}]   ;;  %s3279_s6 = inlined_call_operand.vmem [shape: bf16[2,22,22,8], index: 6, kind: input, shape index: {}]   ;;  %s3280_s7 = inlined_call_operand.vmem [shape: bf16[49,8,8], index: 7, kind: input, shape index: {}]   ;;  %s3281_s8 = inlined_call_operand.vmem [shape: bf16[2,16,16,8], index: 8, kind: output, shape index: {0}]   ;;  %s3282_s9 = inlined_call_operand.vmem [shape: f32[2,16,2,8], index: 9, kind: output, shape index: {1}]  }
   0x1   :  { %s2734_s11 = smov 0   ;;  %s2736_s12 = smov 0  }
   0x2   :  { %s2738_s13 = smov 0  }
   0x3 LB: > { %s29_s14 = sadd.s32 1, %s2670_s11  ;;  %s32_s15 = sadd.s32 1, %s2674_s12  ;;  %s2678_s13 = sphi %s2738_s13, %s20_s13   ;;  %s2674_s12 = sphi %s2736_s12, %s3286_s12   ;;  %s2670_s11 = sphi %s2734_s11, %s3285_s11   ;;  %s2666_s10 = sphi %s2732_s10, %s3284_s10   ;;  %s2662_s30 = sphi %s2730_s30, %s3283_s30  }
   0x4   : > { %p30_p0 = scmp.ge.s32.totalorder %s29_s14, 16  ;;  %p2445_p1 = scmp.ge.s32.totalorder %s2678_s13, 1 }
   0x5   : > { %p432_p2 = scmp.lt.s32.totalorder %s2678_s13, 33 }
   0x6   : > { %s3288_s14 = smov (%p30_p0, %s29_s14), 0  ;;  %s3290_s15 = smov (!%p30_p0, %s32_s15), %s2674_s12 }
   0x7   : > { %p433_p3 = pnand %p2445_p1, %p432_p2  ;;  %p34_p4 = scmp.ge.s32.totalorder %s3290_s15, 2 }
   0x8   : > { %p544_p5 = scmp.lt.s32.totalorder (!%p433_p3), %s2666_s10, 1  ;;  %p546_p6 = scmp.lt.s32.totalorder (!%p433_p3), %s2662_s30, 21 }
   0x9   : > { %s3292_s15 = smov (%p34_p4, %s3290_s15), 0  ;;  %436 = sbr.rel (%p433_p3) target bundleno = 379 (0x17b), region = 52 }
   0xa   : > { %s553_s21 = sadd.s32 (!%p433_p3), 1, %s2662_s30  ;;  %s564_s17 = sadd.s32 (!%p433_p3), 2, %s2662_s30 }
   0xb   : > { %p556_p7 = scmp.lt.s32.totalorder (!%p433_p3), %s553_s21, 21  ;;  %p567_p8 = scmp.lt.s32.totalorder (!%p433_p3), %s564_s17, 21 }
   0xc   : > { %s586_s20 = sadd.s32 (!%p433_p3), 4, %s2662_s30  ;;  %p621_p13 = scmp.lt.s32.totalorder (!%p433_p3), %s2662_s30, 15 }
   0xd   : > { %p589_p10 = scmp.lt.s32.totalorder (!%p433_p3), %s586_s20, 21 }
   0xe   : > { %vm668_vm0 = vcmask 1043456   ;;  %v2465_v0 = vld [vmem:[%s3280_s7 + $0x8] sm:$0xf]  ;;  %v2458_v1 = vld [vmem:[%s3280_s7 + $0x4] sm:$0xf]  ;;  %s3294_s10 = smov (!%p544_p5, %s2666_s10), 1 }
   0xf   : > { %v715_v2 = vsel %vm668_vm0, %v2465_v0, 0  ;;  %v670_v3 = vsel %vm668_vm0, %v2458_v1, 0  ;;  %v640_v4 = vld [vmem:[%s3280_s7] sm:$0xf]  ;;  %v2467_v6 = vld [vmem:[%s3280_s7 + $0xc] sm:$0xf] }
  0x10   : > { %724 = vmatpush.bf16.msra.mxu2 %v715_v2  ;;  %679 = vmatpush.bf16.msra.mxu0 %v670_v3  ;;  %v689_v5 = vsel %vm668_vm0, %v640_v4, 0  ;;  %s547_s24 = scalar_select %p546_p6, %s2662_s30, 21  ;;  %v749_v7 = vsel %vm668_vm0, %v2467_v6, 0  ;;  %v2469_v8 = vld [vmem:[%s3280_s7 + $0x10] sm:$0xf]  ;;  %vm664_vm1 = vcmask 64512  }
  0x11   : > { %698 = vmatpush.bf16.msra.mxu1 %v689_v5  ;;  %s2786_s27 = smul.u32 66, %s3294_s10  ;;  %758 = vmatpush.bf16.msra.mxu3 %v749_v7  ;;  %v777_v9 = vsel %vm668_vm0, %v2469_v8, 0  ;;  %v2473_v10 = vld [vmem:[%s3280_s7 + $0x18] sm:$0xf]  ;;  %v2475_v12 = vld [vmem:[%s3280_s7 + $0x1c] sm:$0xf] }
  0x12   : > { %s2592_s16 = smul.u32 3, %s547_s24  ;;  %v837_v11 = vsel %vm668_vm0, %v2473_v10, 0  ;;  %v2471_v13 = vld [vmem:[%s3280_s7 + $0x14] sm:$0xf]  ;;  %v869_v14 = vsel %vm668_vm0, %v2475_v12, 0  ;;  %s3296_s21 = smov (!%p556_p7, %s553_s21), 21 }
  0x13   : > { %v809_v15 = vsel %vm668_vm0, %v2471_v13, 0  ;;  %v2483_v16 = vld [vmem:[%s3280_s7 + $0x24] sm:$0xf]  ;;  %v2485_v23 = vld [vmem:[%s3280_s7 + $0x28] sm:$0xf]  ;;  %vm707_vm2 = vcmask 1046528  }
  0x14   : > { %786 = vmatpush.bf16.msrb.mxu0 %v777_v9  ;;  %846 = vmatpush.bf16.msrb.mxu2 %v837_v11  ;;  %s550_s22 = sadd.s32 %s2786_s27, %s2592_s16  ;;  %v934_v19 = vsel %vm668_vm0, %v2483_v16, 0  ;;  %s2594_s18 = smul.u32 3, %s3296_s21  ;;  %vm651_vm3 = vsmask.f32 7424  ;;  %v2481_v32 = vld [vmem:[%s3280_s7 + $0x20] sm:$0xf] }
  0x15   : > { %878 = vmatpush.bf16.msrb.mxu3 %v869_v14  ;;  %818 = vmatpush.bf16.msrb.mxu1 %v809_v15  ;;  %s2446_s23 = sshll.u32 %s550_s22, 2  ;;  %v967_v33 = vsel %vm668_vm0, %v2485_v23, 0  ;;  %v2487_v42 = vld [vmem:[%s3280_s7 + $0x2c] sm:$0xf]  ;;  %vm735_vm4 = vsmask.f32 6400 }
  0x16   : > { %s552_s29 = scalar_lea.vmem %s3273_s0, %s2446_s23  ;;  %s560_s21 = sadd.s32 %s2594_s18, %s2786_s27  ;;  %v907_v43 = vsel %vm668_vm0, %v2481_v32, 0  ;;  %v994_v48 = vsel %vm668_vm0, %v2487_v42, 0  ;;  %vm797_vm5 = vsmask.f32 5376  ;;  %v2491_v53 = vld [vmem:[%s3280_s7 + $0x34] sm:$0xf] }
  0x17   : > { %v2809_v17 = vld [vmem:[%s552_s29] sm:$0xff]  ;;  %v639_v18 = vld [vmem:[%s552_s29 + $0x8] sm:$0x7]  ;;  %s2447_s24 = sshll.u32 %s560_s21, 2  ;;  %v1052_v55 = vsel %vm668_vm0, %v2491_v53, 0  ;;  %vm829_vm6 = vcmask 1044480  }
  0x18   : > { %v648_v20 = vunpack.c.l.b16 %v639_v18  ;;  %v653_v21 = vshrl.u32 %v2809_v17, 16  ;;  %v655_v22 = vshll.u32 %v2809_v17, 16  ;;  %2464 = vmatmul.msk.bf16.vlgmr.msra.gmra.mxu1 %vm664_vm1, %v2809_v17  ;;  %v708_v25 = vrot.slane %v2809_v17, 1  ;;  %s562_s28 = scalar_lea.vmem %s3274_s1, %s2447_s24  ;;  %v2493_v61 = vld [vmem:[%s3280_s7 + $0x38] sm:$0xf]  ;;  %s3298_s17 = smov (!%p567_p8, %s564_s17), 21 }
  0x19   : > { %943 = vmatpush.bf16.msra.mxu1 %v934_v19  ;;  %v857_v52 = vld [vmem:[%s562_s28 + $0x8] sm:$0x7]  ;;  %v830_v56 = vrot.slane %v2809_v17, 3  ;;  %v770_v59 = vrot.slane %v2809_v17, 2  ;;  %vm769_vm7 = vcmask 1045504   ;;  %v1084_v1 = vsel %vm668_vm0, %v2493_v61, 0 }
  0x1a   : > { %v2821_v24 = vpack.c.b16 %v648_v20, %v648_v20  ;;  %v657_v26 = vrot.slane %v655_v22, 1  ;;  %v736_v27 = vrot.slane %v653_v21, 1  ;;  %v737_v28 = vrot.slane %v655_v22, 2  ;;  %v2489_v0 = vld [vmem:[%s3280_s7 + $0x30] sm:$0xf]  ;;  %v2869_v3 = vld [vmem:[%s562_s28] sm:$0xff] }
  0x1b   : > { %v798_v36 = vrot.slane %v653_v21, 2  ;;  %v799_v37 = vrot.slane %v655_v22, 3  ;;  %v890_v58 = vunpack.c.l.b16 %v857_v52  ;;  %v2499_v4 = vld [vmem:[%s3280_s7 + $0x3c] sm:$0xf]  ;;  %v1025_v5 = vsel %vm668_vm0, %v2489_v0, 0  ;;  %s2595_s24 = smul.u32 3, %s3298_s17 }
  0x1c   : > { %v709_v29 = vrot.slane %v2821_v24, 1  ;;  %v660_v30 = vshll.u32 %v2821_v24, 16  ;;  %v739_v31 = vshrl.u32 %v2821_v24, 16  ;;  %v658_v34 = vor.u32 %v657_v26, %v653_v21  ;;  %v2503_v17 = vld [vmem:[%s3280_s7 + $0x44] sm:$0xf]  ;;  %s3302_s20 = smov (!%p589_p10, %s586_s20), 21 }
  0x1d   : > { %v738_v35 = vor.u32 %v737_v28, %v736_v27  ;;  %v800_v50 = vor.u32 %v799_v37, %v798_v36  ;;  %v831_v57 = vrot.slane %v2821_v24, 3  ;;  %v771_v60 = vrot.slane %v2821_v24, 2  ;;  %s571_s25 = sadd.s32 %s2595_s24, %s2786_s27  ;;  %s608_s21 = sadd.s32 6, %s2662_s30 }
  0x1e   : > { %v710_v38 = vsel %vm707_vm2, %v708_v25, %v709_v29  ;;  %v662_v39 = vrot.slane %v660_v30, 1  ;;  %v741_v40 = vrot.slane %v739_v31, 1  ;;  %v742_v41 = vrot.slane %v660_v30, 2  ;;  %s2448_s29 = sshll.u32 %s571_s25, 2  ;;  %v2505_v25 = vld [vmem:[%s3280_s7 + $0x48] sm:$0xf] }
  0x1f   : > { %2466 = vmatmul.msk.bf16.vlgmr.msra.gmra.mxu2 %vm664_vm1, %v710_v38  ;;  %v801_v44 = vrot.slane %v739_v31, 2  ;;  %v802_v47 = vrot.slane %v660_v30, 3  ;;  %v832_v62 = vsel %vm829_vm6, %v830_v56, %v831_v57  ;;  %v2862_v63 = vpack.c.b16 %v890_v58, %v890_v58  ;;  %s573_s18 = scalar_lea.vmem %s3275_s2, %s2448_s29  ;;  %v2501_v29 = vld [vmem:[%s3280_s7 + $0x40] sm:$0xf]  ;;  %s575_s25 = sadd.s32 3, %s2662_s30 }
  0x20   : > { %v663_v45 = vsel %vm651_vm3, %v658_v34, %v662_v39  ;;  %v743_v46 = vor.u32 %v742_v41, %v741_v40  ;;  %976 = vmatpush.bf16.msra.mxu2 %v967_v33  ;;  %v772_v2 = vsel %vm769_vm7, %v770_v59, %v771_v60  ;;  %v2877_v6 = vshrl.u32 %v2869_v3, 16  ;;  %v1072_v30 = vld [vmem:[%s573_s18 + $0x8] sm:$0x7]  ;;  %v2507_v33 = vld [vmem:[%s3280_s7 + $0x4c] sm:$0xf]  ;;  %v2925_v36 = vld [vmem:[%s573_s18] sm:$0xff] }
  0x21   : > { %2463 = vmatmul.msk.bf16.vlgmr.msra.gmra.mxu0 %vm664_vm1, %v663_v45  ;;  %v803_v51 = vor.u32 %v802_v47, %v801_v44  ;;  %v2880_v7 = vshll.u32 %v2869_v3, 16  ;;  %v2883_v8 = vshll.u32 %v2862_v63, 16  ;;  %v957_v9 = vshrl.u32 %v2862_v63, 16  ;;  %p578_p9 = scmp.lt.s32.totalorder %s575_s25, 21  ;;  %v2517_v56 = vld [vmem:[%s3280_s7 + $0x58] sm:$0xf] }
  0x22   : > { %v744_v49 = vsel %vm735_vm4, %v738_v35, %v743_v46  ;;  %916 = vmatpush.bf16.msra.mxu0 %v907_v43  ;;  %v1122_v10 = vsel %vm668_vm0, %v2499_v4, 0  ;;  %v927_v11 = vrot.slane %v2869_v3, 1  ;;  %v928_v12 = vrot.slane %v2862_v63, 1  ;;  %v2511_v43 = vld [vmem:[%s3280_s7 + $0x54] sm:$0xf]  ;;  %p611_p12 = scmp.lt.s32.totalorder %s608_s21, 21 }
  0x23   : > { %2468 = vmatmul.msk.bf16.vlgmr.msra.gmra.mxu3 %vm664_vm1, %v744_v49  ;;  %v804_v54 = vsel %vm797_vm5, %v800_v50, %v803_v51  ;;  %v954_v13 = vrot.slane %v2877_v6, 1  ;;  %v955_v14 = vrot.slane %v2880_v7, 2  ;;  %v959_v15 = vrot.slane %v957_v9, 1  ;;  %s3300_s25 = smov (!%p578_p9, %s575_s25), 21  ;;  %v2509_v59 = vld [vmem:[%s3280_s7 + $0x50] sm:$0xf] }
  0x24   : > { %1003 = vmatpush.bf16.msra.mxu3 %v994_v48  ;;  %v960_v16 = vrot.slane %v2883_v8, 2  ;;  %v896_v18 = vrot.slane %v2880_v7, 1  ;;  %v929_v19 = vsel %vm707_vm2, %v927_v11, %v928_v12  ;;  %v1182_v20 = vsel %vm668_vm0, %v2503_v17, 0  ;;  %s2596_s19 = smul.u32 3, %s3300_s25  ;;  %s3306_s21 = smov (!%p611_p12, %s608_s21), 21 }
  0x25   : > { %v956_v21 = vor.u32 %v955_v14, %v954_v13  ;;  %v901_v24 = vrot.slane %v2883_v8, 1  ;;  %v987_v27 = vrot.slane %v2869_v3, 2  ;;  %v988_v28 = vrot.slane %v2862_v63, 2  ;;  %s2597_s25 = smul.u32 3, %s3302_s20 }
  0x26   : > { %v961_v22 = vor.u32 %v960_v16, %v959_v15  ;;  %v897_v23 = vor.u32 %v896_v18, %v2877_v6  ;;  %v1209_v31 = vsel %vm668_vm0, %v2505_v25, 0  ;;  %v1149_v34 = vsel %vm668_vm0, %v2501_v29, 0  ;;  %s582_s22 = sadd.s32 %s2596_s19, %s2786_s27  ;;  %v2527_v29 = vld [vmem:[%s3280_s7 + $0x6c] sm:$0xf]  ;;  %s597_s19 = sadd.s32 5, %s2662_s30 }
  0x27   : > { %v989_v35 = vsel %vm769_vm7, %v987_v27, %v988_v28  ;;  %v1105_v37 = vunpack.c.l.b16 %v1072_v30  ;;  %v1240_v38 = vsel %vm668_vm0, %v2507_v33, 0  ;;  %v1045_v39 = vrot.slane %v2869_v3, 3  ;;  %s2449_s23 = sshll.u32 %s582_s22, 2  ;;  %s593_s17 = sadd.s32 %s2597_s25, %s2786_s27 }
  0x28   : > { %2472 = vmatmul.msk.bf16.vlgmr.msrb.gmra.mxu1 %vm664_vm1, %v804_v54  ;;  %v962_v26 = vsel %vm735_vm4, %v956_v21, %v961_v22  ;;  %v902_v32 = vsel %vm651_vm3, %v897_v23, %v901_v24  ;;  %v1046_v40 = vrot.slane %v2862_v63, 3  ;;  %v1109_v42 = vshll.u32 %v2925_v36, 16  ;;  %s584_s29 = scalar_lea.vmem %s3276_s3, %s2449_s23  ;;  %s2450_s20 = sshll.u32 %s593_s17, 2 }
  0x29   : > { %1061 = vmatpush.bf16.msrb.mxu1 %v1052_v55  ;;  %v2933_v41 = vpack.c.b16 %v1105_v37, %v1105_v37  ;;  %v1014_v44 = vrot.slane %v2877_v6, 2  ;;  %v1015_v45 = vrot.slane %v2880_v7, 3  ;;  %v1017_v46 = vrot.slane %v957_v9, 2  ;;  %v1287_v17 = vld [vmem:[%s584_s29 + $0x8] sm:$0x7]  ;;  %v2984_v24 = vld [vmem:[%s584_s29] sm:$0xff]  ;;  %s595_s23 = scalar_lea.vmem %s3277_s4, %s2450_s20 }
  0x2a   : > { %v1018_v47 = vrot.slane %v2883_v8, 3  ;;  %v1047_v48 = vsel %vm829_vm6, %v1045_v39, %v1046_v40  ;;  %v1299_v49 = vsel %vm668_vm0, %v2511_v43, 0  ;;  %v1107_v50 = vshrl.u32 %v2925_v36, 16  ;;  %v2523_v8 = vld [vmem:[%s3280_s7 + $0x64] sm:$0xf]  ;;  %p600_p11 = scmp.lt.s32.totalorder %s597_s19, 21 }
  0x2b   : > { %v1111_v51 = vrot.slane %v1109_v42, 1  ;;  %v1114_v52 = vshll.u32 %v2933_v41, 16  ;;  %v1016_v53 = vor.u32 %v1015_v45, %v1014_v44  ;;  %v1172_v55 = vshrl.u32 %v2933_v41, 16  ;;  %v2535_v39 = vld [vmem:[%s3280_s7 + $0x74] sm:$0xf]  ;;  %s3308_s30 = smov (!%p621_p13, %s2662_s30), 15 }
  0x2c   : > { %v1019_v54 = vor.u32 %v1018_v47, %v1017_v46  ;;  %v1337_v61 = vsel %vm668_vm0, %v2517_v56, 0  ;;  %v1170_v63 = vrot.slane %v1109_v42, 2  ;;  %v1203_v11 = vrot.slane %v2933_v41, 2  ;;  %v2537_v46 = vld [vmem:[%s3280_s7 + $0x78] sm:$0xf]  ;;  %s3304_s19 = smov (!%p600_p11, %s597_s19), 21 }
  0x2d   : > { %v1112_v57 = vor.u32 %v1111_v51, %v1107_v50  ;;  %v1116_v58 = vrot.slane %v1114_v52, 1  ;;  %v1174_v0 = vrot.slane %v1172_v55, 1  ;;  %v1424_v12 = vsel %vm668_vm0, %v2523_v8, 0  ;;  %v2539_v51 = vld [vmem:[%s3280_s7 + $0x7c] sm:$0xf]  ;;  %s2598_s20 = smul.u32 3, %s3304_s19 }
  0x2e   : > { %v1020_v60 = vsel %vm797_vm5, %v1016_v53, %v1019_v54  ;;  %v1229_v13 = vrot.slane %v1107_v50, 2  ;;  %v1230_v14 = vrot.slane %v1109_v42, 3  ;;  %v1232_v15 = vrot.slane %v1172_v55, 2  ;;  %s2456_s25 = sshll.u32 %s3294_s10, 4 }
  0x2f   : > { %2474 = vmatmul.msk.bf16.vlgmr.msrb.gmra.mxu2 %vm664_vm1, %v832_v62  ;;  %v1169_v62 = vrot.slane %v1107_v50, 1  ;;  %v1117_v4 = vsel %vm651_vm3, %v1112_v57, %v1116_v58  ;;  %v1233_v16 = vrot.slane %v1114_v52, 3  ;;  %v1142_v18 = vrot.slane %v2925_v36, 1  ;;  %v2529_v50 = vld [vmem:[%s3280_s7 + $0x70] sm:$0xf]  ;;  %s604_s28 = sadd.s32 %s2598_s20, %s2786_s27  ;;  %s633_s26 = sadd.s32 %s2456_s25, %s3308_s30 }
  0x30   : > { %1093 = vmatpush.bf16.msrb.mxu2 %v1084_v1  ;;  %v1175_v1 = vrot.slane %v1114_v52, 2  ;;  %v1231_v22 = vor.u32 %v1230_v14, %v1229_v13  ;;  %v1320_v25 = vunpack.c.l.b16 %v1287_v17  ;;  %v1324_v33 = vshll.u32 %v2984_v24, 16  ;;  %v2545_v13 = vld [vmem:[%s3280_s7 + $0x88] sm:$0xf]  ;;  %s2451_s17 = sshll.u32 %s604_s28, 2  ;;  %s2457_s28 = sshll.u32 %s633_s26, 1 }
  0x31   : > { %2470 = vmatmul.msk.bf16.vlgmr.msrb.gmra.mxu0 %vm664_vm1, %v772_v2  ;;  %v2519_v2 = vld [vmem:[%s3280_s7 + $0x5c] sm:$0xf]  ;;  %v1171_v6 = vor.u32 %v1170_v63, %v1169_v62  ;;  %v1234_v23 = vor.u32 %v1233_v16, %v1232_v15  ;;  %v1552_v40 = vsel %vm668_vm0, %v2535_v39, 0  ;;  %v1260_v44 = vrot.slane %v2925_v36, 3  ;;  %v2543_v62 = vld [vmem:[%s3280_s7 + $0x84] sm:$0xf]  ;;  %s606_s20 = scalar_lea.vmem %s3278_s5, %s2451_s17 }
  0x32   : > { %1034 = vmatpush.bf16.msrb.mxu0 %v1025_v5  ;;  %v1364_v5 = vsel %vm668_vm0, %v2519_v2, 0  ;;  %v1176_v7 = vor.u32 %v1175_v1, %v1174_v0  ;;  %v1326_v37 = vrot.slane %v1324_v33, 1  ;;  %v1261_v45 = vrot.slane %v2933_v41, 3  ;;  %v1502_v0 = vld [vmem:[%s595_s23 + $0x8] sm:$0x7]  ;;  %s2599_s17 = smul.u32 3, %s3306_s21 }
  0x33   : > { %2480 = vmatmul.msk.bf16.vlgmr.msrb.gmra.mxu3 %vm664_vm1, %v2869_v3  ;;  %v1267_v3 = vsel %vm668_vm0, %v2509_v59, 0  ;;  %v1514_v52 = vsel %vm668_vm0, %v2529_v50, 0  ;;  %v1612_v55 = vsel %vm668_vm0, %v2539_v51, 0  ;;  %v1417_v56 = vrot.slane %v2984_v24, 2  ;;  %v2557_v39 = vld [vmem:[%s3280_s7 + $0x98] sm:$0xf] }
  0x34   : > { %1131 = vmatpush.bf16.msrb.mxu3 %v1122_v10  ;;  %v1177_v9 = vsel %vm735_vm4, %v1171_v6, %v1176_v7  ;;  %v1202_v10 = vrot.slane %v2925_v36, 2  ;;  %v1445_v59 = vrot.slane %v1324_v33, 3  ;;  %v1385_v1 = vrot.slane %v1324_v33, 2  ;;  %s615_s18 = sadd.s32 %s2599_s17, %s2786_s27  ;;  %s2454_s27 = sshll.u32 %s3294_s10, 5 }
  0x35   : > { %v1670_v6 = vsel %vm668_vm0, %v2543_v62, 0  ;;  %v1475_v15 = vrot.slane %v2984_v24, 3  ;;  %s2452_s19 = sshll.u32 %s615_s18, 2  ;;  %vm2147_vm8 = vcmask 60416   ;;  %s635_s17 = scalar_lea.vmem %s3282_s9, %s2457_s28  ;;  %vm2159_vm9 = vcmask 57344  }
  0x36   : > { %v1204_v21 = vsel %vm769_vm7, %v1202_v10, %v1203_v11  ;;  %s617_s21 = scalar_lea.vmem %s3279_s6, %s2452_s19  ;;  %s2453_s19 = sshll.u32 %s3308_s30, 1 }
  0x38   : > { %2484 = vmatmul.msk.bf16.vlgmr.msra.gmra.mxu1 %vm664_vm1, %v929_v19  ;;  %v1143_v19 = vrot.slane %v2933_v41, 1  ;;  %v1262_v41 = vsel %vm829_vm6, %v1260_v44, %v1261_v45  ;;  %v2553_v45 = vld [vmem:[%s3280_s7 + $0x90] sm:$0xf] }
  0x39   : > { %1191 = vmatpush.bf16.msra.mxu1 %v1182_v20  ;;  %v2525_v20 = vld [vmem:[%s3280_s7 + $0x68] sm:$0xf]  ;;  %v1767_v51 = vsel %vm668_vm0, %v2553_v45, 0 }
  0x3a   : > { %v1455_v27 = vsel %vm668_vm0, %v2525_v20, 0  ;;  %v1144_v28 = vsel %vm707_vm2, %v1142_v18, %v1143_v19  ;;  %v2541_v18 = vld [vmem:[%s3280_s7 + $0x80] sm:$0xf]  ;;  %v1697_v19 = vsel %vm668_vm0, %v2545_v13, 0 }
  0x3f   : > { %2486 = vmatmul.msk.bf16.vlgmr.msra.gmra.mxu2 %vm664_vm1, %v962_v26  ;;  %v2521_v26 = vld [vmem:[%s3280_s7 + $0x60] sm:$0xf] }
  0x40   : > { %1218 = vmatpush.bf16.msra.mxu2 %v1209_v31  ;;  %v1397_v30 = vsel %vm668_vm0, %v2521_v26, 0  ;;  %v1235_v31 = vsel %vm797_vm5, %v1231_v22, %v1234_v23  ;;  %v2547_v22 = vld [vmem:[%s3280_s7 + $0x8c] sm:$0xf]  ;;  %v1639_v23 = vsel %vm668_vm0, %v2541_v18, 0 }
  0x41   : > { %2482 = vmatmul.msk.bf16.vlgmr.msra.gmra.mxu0 %vm664_vm1, %v902_v32  ;;  %v2998_v32 = vpack.c.b16 %v1320_v25, %v1320_v25 }
  0x42   : > { %1158 = vmatpush.bf16.msra.mxu0 %v1149_v34  ;;  %v1482_v34 = vsel %vm668_vm0, %v2527_v29, 0 }
  0x43   : > { %2488 = vmatmul.msk.bf16.vlgmr.msra.gmra.mxu3 %vm664_vm1, %v989_v35  ;;  %v1322_v35 = vshrl.u32 %v2984_v24, 16  ;;  %v1387_v54 = vshrl.u32 %v2998_v32, 16  ;;  %v1418_v57 = vrot.slane %v2998_v32, 2  ;;  %v1476_v16 = vrot.slane %v2998_v32, 3 }
  0x44   : > { %1249 = vmatpush.bf16.msra.mxu3 %v1240_v38  ;;  %v1329_v38 = vshll.u32 %v2998_v32, 16 }
  0x45   : > { %v1327_v42 = vor.u32 %v1326_v37, %v1322_v35  ;;  %v1444_v58 = vrot.slane %v1322_v35, 2  ;;  %v1384_v63 = vrot.slane %v1322_v35, 1  ;;  %v1389_v2 = vrot.slane %v1387_v54, 1 }
  0x46   : > { %v1331_v43 = vrot.slane %v1329_v38, 1 }
  0x47   : > { %v1446_v7 = vor.u32 %v1445_v59, %v1444_v58  ;;  %v1386_v10 = vor.u32 %v1385_v1, %v1384_v63  ;;  %v2563_v1 = vld [vmem:[%s3280_s7 + $0xa4] sm:$0xf] }
  0x48   : > { %2492 = vmatmul.msk.bf16.vlgmr.msrb.gmra.mxu1 %vm664_vm1, %v1047_v48  ;;  %v1332_v47 = vsel %vm651_vm3, %v1327_v42, %v1331_v43  ;;  %v1357_v48 = vrot.slane %v2984_v24, 1 }
  0x49   : > { %1308 = vmatpush.bf16.msrb.mxu1 %v1299_v49  ;;  %v1358_v49 = vrot.slane %v2998_v32, 1 }
  0x4b   : > { %v1359_v53 = vsel %vm707_vm2, %v1357_v48, %v1358_v49 }
  0x4f   : > { %2498 = vmatmul.msk.bf16.vlgmr.msrb.gmra.mxu2 %vm664_vm1, %v2925_v36  ;;  %v1579_v36 = vsel %vm668_vm0, %v2537_v46, 0 }
  0x50   : > { %1346 = vmatpush.bf16.msrb.mxu2 %v1337_v61  ;;  %v1448_v61 = vrot.slane %v1329_v38, 3 }
  0x51   : > { %2490 = vmatmul.msk.bf16.vlgmr.msrb.gmra.mxu0 %vm664_vm1, %v1020_v60  ;;  %v1447_v60 = vrot.slane %v1387_v54, 2 }
  0x52   : > { %1276 = vmatpush.bf16.msrb.mxu0 %v1267_v3  ;;  %v1390_v3 = vrot.slane %v1329_v38, 2 }
  0x53   : > { %2500 = vmatmul.msk.bf16.vlgmr.msrb.gmra.mxu3 %vm664_vm1, %v1117_v4  ;;  %v1419_v4 = vsel %vm769_vm7, %v1417_v56, %v1418_v57  ;;  %v1449_v8 = vor.u32 %v1448_v61, %v1447_v60  ;;  %v1717_v56 = vld [vmem:[%s606_s20 + $0x8] sm:$0x7] }
  0x54   : > { %1373 = vmatpush.bf16.msrb.mxu3 %v1364_v5  ;;  %v3045_v5 = vld [vmem:[%s595_s23] sm:$0xff]  ;;  %v1391_v11 = vor.u32 %v1390_v3, %v1389_v2  ;;  %v1750_v61 = vunpack.c.l.b16 %v1717_v56 }
  0x55   : > { %v1450_v14 = vsel %vm797_vm5, %v1446_v7, %v1449_v8  ;;  %v1537_v25 = vshrl.u32 %v3045_v5, 16  ;;  %v1572_v32 = vrot.slane %v3045_v5, 1  ;;  %v1690_v59 = vrot.slane %v3045_v5, 3 }
  0x56   : > { %v1392_v20 = vsel %vm735_vm4, %v1386_v10, %v1391_v11  ;;  %v1632_v62 = vrot.slane %v3045_v5, 2  ;;  %v3120_v3 = vpack.c.b16 %v1750_v61, %v1750_v61  ;;  %v2571_v10 = vld [vmem:[%s3280_s7 + $0xac] sm:$0xf] }
  0x57   : > { %v1659_v48 = vrot.slane %v1537_v25, 2  ;;  %v1982_v18 = vsel %vm668_vm0, %v2571_v10, 0 }
  0x58   : > { %2504 = vmatmul.msk.bf16.vlgmr.msra.gmra.mxu1 %vm664_vm1, %v1177_v9  ;;  %v1535_v9 = vunpack.c.l.b16 %v1502_v0  ;;  %v2565_v0 = vld [vmem:[%s3280_s7 + $0xa8] sm:$0xf] }
  0x59   : > { %1433 = vmatpush.bf16.msra.mxu1 %v1424_v12  ;;  %v1539_v12 = vshll.u32 %v3045_v5, 16 }
  0x5a   : > { %v3056_v17 = vpack.c.b16 %v1535_v9, %v1535_v9  ;;  %v3130_v9 = vld [vmem:[%s606_s20] sm:$0xff]  ;;  %s625_s20 = sadd.s32 %s2454_s27, %s2453_s19 }
  0x5b   : > { %v1600_v35 = vrot.slane %v1539_v12, 2  ;;  %v1660_v49 = vrot.slane %v1539_v12, 3  ;;  %v1847_v45 = vrot.slane %v3130_v9, 2 }
  0x5c   : > { %v1544_v26 = vshll.u32 %v3056_v17, 16  ;;  %v1573_v33 = vrot.slane %v3056_v17, 1  ;;  %v1691_v60 = vrot.slane %v3056_v17, 3  ;;  %v1633_v63 = vrot.slane %v3056_v17, 2 }
  0x5d   : > { %v1661_v54 = vor.u32 %v1660_v49, %v1659_v48  ;;  %v1932_v49 = vld [vmem:[%s617_s21 + $0x8] sm:$0x7] }
  0x5e   : > { %v1546_v29 = vrot.slane %v1544_v26, 1  ;;  %v1605_v38 = vrot.slane %v1544_v26, 2  ;;  %v1574_v42 = vsel %vm707_vm2, %v1572_v32, %v1573_v33  ;;  %v1692_v2 = vsel %vm829_vm6, %v1690_v59, %v1691_v60 }
  0x5f   : > { %2506 = vmatmul.msk.bf16.vlgmr.msra.gmra.mxu2 %vm664_vm1, %v1204_v21  ;;  %v1541_v21 = vrot.slane %v1539_v12, 1  ;;  %v1634_v8 = vsel %vm769_vm7, %v1632_v62, %v1633_v63  ;;  %v1965_v59 = vunpack.c.l.b16 %v1932_v49  ;;  %v1905_v63 = vrot.slane %v3130_v9, 3 }
  0x60   : > { %1464 = vmatpush.bf16.msra.mxu2 %v1455_v27  ;;  %v1729_v27 = vsel %vm668_vm0, %v2547_v22, 0 }
  0x61   : > { %2502 = vmatmul.msk.bf16.vlgmr.msra.gmra.mxu0 %vm664_vm1, %v1144_v28  ;;  %v1542_v28 = vor.u32 %v1541_v21, %v1537_v25  ;;  %v1788_v21 = vrot.slane %v3120_v3, 1 }
  0x62   : > { %1406 = vmatpush.bf16.msra.mxu0 %v1397_v30  ;;  %v1602_v30 = vshrl.u32 %v3056_v17, 16  ;;  %v1817_v17 = vshrl.u32 %v3120_v3, 16 }
  0x63   : > { %2508 = vmatmul.msk.bf16.vlgmr.msra.gmra.mxu3 %vm664_vm1, %v1235_v31  ;;  %v1547_v31 = vsel %vm651_vm3, %v1542_v28, %v1546_v29 }
  0x64   : > { %1491 = vmatpush.bf16.msra.mxu3 %v1482_v34  ;;  %v1599_v34 = vrot.slane %v1537_v25, 1  ;;  %v1604_v37 = vrot.slane %v1602_v30, 1  ;;  %v1662_v50 = vrot.slane %v1602_v30, 2  ;;  %v1819_v25 = vrot.slane %v1817_v17, 1 }
  0x66   : > { %v1601_v43 = vor.u32 %v1600_v35, %v1599_v34  ;;  %v1606_v44 = vor.u32 %v1605_v38, %v1604_v37 }
  0x68   : > { %2516 = vmatmul.msk.bf16.vlgmr.msrb.gmra.mxu1 %vm664_vm1, %v2984_v24  ;;  %v1477_v24 = vsel %vm829_vm6, %v1475_v15, %v1476_v16  ;;  %v3141_v15 = vshll.u32 %v3130_v9, 16  ;;  %v3144_v16 = vshll.u32 %v3120_v3, 16 }
  0x69   : > { %1561 = vmatpush.bf16.msrb.mxu1 %v1552_v40  ;;  %v2555_v40 = vld [vmem:[%s3280_s7 + $0x94] sm:$0xf] }
  0x6a   : > { %v1794_v46 = vsel %vm668_vm0, %v2555_v40, 0  ;;  %v1756_v29 = vrot.slane %v3141_v15, 1  ;;  %v2577_v40 = vld [vmem:[%s3280_s7 + $0xb8] sm:$0xf] }
  0x6f   : > { %2518 = vmatmul.msk.bf16.vlgmr.msrb.gmra.mxu2 %vm664_vm1, %v1332_v47  ;;  %v1827_v47 = vsel %vm668_vm0, %v2557_v39, 0  ;;  %v1761_v39 = vrot.slane %v3144_v16, 1 }
  0x70   : > { %1588 = vmatpush.bf16.msrb.mxu2 %v1579_v36  ;;  %v1663_v36 = vrot.slane %v1544_v26, 3  ;;  %v1820_v26 = vrot.slane %v3144_v16, 2 }
  0x71   : > { %2510 = vmatmul.msk.bf16.vlgmr.msrb.gmra.mxu0 %vm664_vm1, %v1262_v41  ;;  %v2559_v41 = vld [vmem:[%s3280_s7 + $0x9c] sm:$0xf] }
  0x72   : > { %1523 = vmatpush.bf16.msrb.mxu0 %v1514_v52  ;;  %v1607_v52 = vsel %vm735_vm4, %v1601_v43, %v1606_v44  ;;  %v1821_v35 = vor.u32 %v1820_v26, %v1819_v25  ;;  %v2575_v43 = vld [vmem:[%s3280_s7 + $0xb4] sm:$0xf]  ;;  %v2581_v25 = vld [vmem:[%s3280_s7 + $0xc0] sm:$0xf] }
  0x73   : > { %2520 = vmatmul.msk.bf16.vlgmr.msrb.gmra.mxu3 %vm664_vm1, %v1359_v53  ;;  %v1854_v53 = vsel %vm668_vm0, %v2559_v41, 0  ;;  %v2042_v48 = vsel %vm668_vm0, %v2575_v43, 0 }
  0x74   : > { %1621 = vmatpush.bf16.msrb.mxu3 %v1612_v55  ;;  %v1664_v55 = vor.u32 %v1663_v36, %v1662_v50  ;;  %v2069_v50 = vsel %vm668_vm0, %v2577_v40, 0 }
  0x76   : > { %v1665_v58 = vsel %vm797_vm5, %v1661_v54, %v1664_v55 }
  0x78   : > { %2524 = vmatmul.msk.bf16.vlgmr.msra.gmra.mxu1 %vm664_vm1, %v1419_v4  ;;  %v2561_v4 = vld [vmem:[%s3280_s7 + $0xa0] sm:$0xf] }
  0x79   : > { %1679 = vmatpush.bf16.msra.mxu1 %v1670_v6  ;;  %v1944_v6 = vsel %vm668_vm0, %v2565_v0, 0  ;;  %v1885_v13 = vsel %vm668_vm0, %v2561_v4, 0  ;;  %v1906_v0 = vrot.slane %v3120_v3, 3 }
  0x7f   : > { %2526 = vmatmul.msk.bf16.vlgmr.msra.gmra.mxu2 %vm664_vm1, %v1450_v14  ;;  %v3138_v14 = vshrl.u32 %v3130_v9, 16 }
  0x80   : > { %1706 = vmatpush.bf16.msra.mxu2 %v1697_v19 }
  0x81   : > { %2522 = vmatmul.msk.bf16.vlgmr.msra.gmra.mxu0 %vm664_vm1, %v1392_v20  ;;  %v1787_v20 = vrot.slane %v3130_v9, 1  ;;  %v1757_v38 = vor.u32 %v1756_v29, %v3138_v14 }
  0x82   : > { %1648 = vmatpush.bf16.msra.mxu0 %v1639_v23  ;;  %v1814_v23 = vrot.slane %v3138_v14, 1 }
  0x83   : > { %2528 = vmatmul.msk.bf16.vlgmr.msra.gmra.mxu3 %vm664_vm1, %v1477_v24  ;;  %v1815_v24 = vrot.slane %v3141_v15, 2  ;;  %v1789_v30 = vsel %vm707_vm2, %v1787_v20, %v1788_v21 }
  0x84   : > { %1738 = vmatpush.bf16.msra.mxu3 %v1729_v27 }
  0x85   : > { %v1816_v34 = vor.u32 %v1815_v24, %v1814_v23 }
  0x87   : > { %v1822_v44 = vsel %vm735_vm4, %v1816_v34, %v1821_v35 }
  0x88   : > { %2536 = vmatmul.msk.bf16.vlgmr.msrb.gmra.mxu1 %vm664_vm1, %v1547_v31 }
  0x89   : > { %1803 = vmatpush.bf16.msrb.mxu1 %v1794_v46  ;;  %v1848_v46 = vrot.slane %v3120_v3, 2 }
  0x8f   : > { %2538 = vmatmul.msk.bf16.vlgmr.msrb.gmra.mxu2 %vm664_vm1, %v1574_v42 }
  0x90   : > { %1836 = vmatpush.bf16.msrb.mxu2 %v1827_v47  ;;  %v2573_v47 = vld [vmem:[%s3280_s7 + $0xb0] sm:$0xf] }
  0x91   : > { %2534 = vmatmul.msk.bf16.vlgmr.msrb.gmra.mxu0 %vm664_vm1, %v3045_v5  ;;  %v1912_v5 = vsel %vm668_vm0, %v2563_v1, 0  ;;  %v2009_v56 = vsel %vm668_vm0, %v2573_v47, 0 }
  0x92   : > { %1776 = vmatpush.bf16.msrb.mxu0 %v1767_v51  ;;  %v1762_v51 = vsel %vm651_vm3, %v1757_v38, %v1761_v39 }
  0x93   : > { %2540 = vmatmul.msk.bf16.vlgmr.msrb.gmra.mxu3 %vm664_vm1, %v1607_v52  ;;  %v2579_v52 = vld [vmem:[%s3280_s7 + $0xbc] sm:$0xf] }
  0x94   : > { %1863 = vmatpush.bf16.msrb.mxu3 %v1854_v53  ;;  %v2100_v61 = vsel %vm668_vm0, %v2579_v52, 0 }
  0x95   : > { %v700_v57 = vpop.f32.mrf.mxu1 }
  0x98   : > { %2544 = vmatmul.msk.bf16.vlgmr.msra.gmra.mxu1 %vm664_vm1, %v1665_v58  ;;  %v3189_v58 = vld [vmem:[%s617_s21] sm:$0xff]  ;;  %s2455_s21 = sshll.u32 %s625_s20, 2 }
  0x99   : > { %1921 = vmatpush.bf16.msra.mxu1 %v1912_v5  ;;  %v3199_v4 = vshll.u32 %v3189_v58, 16  ;;  %v1874_v5 = vrot.slane %v3138_v14, 2  ;;  %s627_s24 = scalar_lea.vmem %s3281_s8, %s2455_s21 }
  0x9b   : > { %v1971_v20 = vrot.slane %v3199_v4, 1  ;;  %v2090_v52 = vrot.slane %v3199_v4, 3 }
  0x9d   : > { %v702_v12 = vpop.f32.mrf.mxu1 }
  0x9e   : > { %v681_v7 = vpop.f32.mrf.mxu0 }
  0x9f   : > { %v701_v11 = vadd.f32 %v700_v57, %v681_v7  ;;  %2546 = vmatmul.msk.bf16.vlgmr.msra.gmra.mxu2 %vm664_vm1, %v1692_v2  ;;  %v1849_v57 = vsel %vm769_vm7, %v1847_v45, %v1848_v46  ;;  %v3196_v2 = vpack.c.b16 %v1965_v59, %v1965_v59  ;;  %v1877_v7 = vrot.slane %v1817_v17, 2 }
  0xa0   : > { %1953 = vmatpush.bf16.msra.mxu2 %v1944_v6  ;;  %v1875_v6 = vrot.slane %v3141_v15, 3 }
  0xa1   : > { %2542 = vmatmul.msk.bf16.vlgmr.msra.gmra.mxu0 %vm664_vm1, %v1634_v8  ;;  %v1878_v8 = vrot.slane %v3144_v16, 3  ;;  %v1974_v14 = vshll.u32 %v3196_v2, 16  ;;  %v2032_v16 = vshrl.u32 %v3196_v2, 16  ;;  %v2003_v59 = vrot.slane %v3196_v2, 1 }
  0xa2   : > { %v726_v19 = vpop.f32.mrf.mxu2  ;;  %1894 = vmatpush.bf16.msra.mxu0 %v1885_v13  ;;  %v1876_v15 = vor.u32 %v1875_v6, %v1874_v5 }
  0xa3   : > { %v731_v22 = vadd.f32 %v726_v19, %v701_v11  ;;  %2552 = vmatmul.msk.bf16.vlgmr.msra.gmra.mxu3 %vm664_vm1, %v3130_v9  ;;  %v1907_v11 = vsel %vm829_vm6, %v1905_v63, %v1906_v0  ;;  %v1967_v19 = vshrl.u32 %v3189_v58, 16  ;;  %v1976_v24 = vrot.slane %v1974_v14, 1 }
  0xa4   : > { %1991 = vmatpush.bf16.msra.mxu3 %v1982_v18 }
  0xa5   : > { %v820_v33 = vpop.f32.mrf.mxu1  ;;  %v1972_v23 = vor.u32 %v1971_v20, %v1967_v19  ;;  %v2029_v29 = vrot.slane %v1967_v19, 1 }
  0xa6   : > { %v683_v27 = vpop.f32.mrf.mxu0  ;;  %v760_v28 = vpop.f32.mrf.mxu3 }
  0xa7   : > { %v703_v31 = vadd.f32 %v702_v12, %v683_v27  ;;  %v765_v32 = vadd.f32 %v760_v28, %v731_v22  ;;  %v1879_v22 = vor.u32 %v1878_v8, %v1877_v7  ;;  %v1977_v38 = vsel %vm651_vm3, %v1972_v23, %v1976_v24 }
  0xa8   : > { %2556 = vmatmul.msk.bf16.vlgmr.msrb.gmra.mxu1 %vm664_vm1, %v1789_v30  ;;  %v2030_v30 = vrot.slane %v3199_v4, 2 }
  0xa9   : > { %2051 = vmatpush.bf16.msrb.mxu1 %v2042_v48  ;;  %v1880_v26 = vsel %vm797_vm5, %v1876_v15, %v1879_v22  ;;  %v2120_v15 = vrot.slane %v3189_v58, 3  ;;  %v2121_v22 = vrot.slane %v3196_v2, 3 }
  0xaa   : > { %v728_v37 = vpop.f32.mrf.mxu2 }
  0xab   : > { %v732_v42 = vadd.f32 %v728_v37, %v703_v31  ;;  %v2034_v31 = vrot.slane %v2032_v16, 1  ;;  %v2127_v37 = vsel %vm668_vm0, %v2581_v25, 0  ;;  %v2122_v23 = vsel %vm829_vm6, %v2120_v15, %v2121_v22 }
  0xad   : > { %v822_v55 = vpop.f32.mrf.mxu1 }
  0xae   : > { %v762_v36 = vpop.f32.mrf.mxu3  ;;  %v788_v41 = vpop.f32.mrf.mxu0 }
  0xaf   : > { %v766_v53 = vadd.f32 %v762_v36, %v732_v42  ;;  %v793_v54 = vadd.f32 %v788_v41, %v765_v32  ;;  %2558 = vmatmul.msk.bf16.vlgmr.msrb.gmra.mxu2 %vm664_vm1, %v1822_v44  ;;  %v2035_v32 = vrot.slane %v1974_v14, 2  ;;  %v2031_v42 = vor.u32 %v2030_v30, %v2029_v29 }
  0xb0   : > { %2078 = vmatpush.bf16.msrb.mxu2 %v2069_v50  ;;  %v2062_v50 = vrot.slane %v3189_v58, 2  ;;  %v2063_v36 = vrot.slane %v3196_v2, 2 }
  0xb1   : > { %v825_v60 = vadd.f32 %v820_v33, %v793_v54  ;;  %2554 = vmatmul.msk.bf16.vlgmr.msrb.gmra.mxu0 %vm664_vm1, %v1762_v51  ;;  %v2036_v43 = vor.u32 %v2035_v32, %v2034_v31  ;;  %v2089_v51 = vrot.slane %v1967_v19, 2  ;;  %v2093_v54 = vrot.slane %v1974_v14, 3 }
  0xb2   : > { %v848_v62 = vpop.f32.mrf.mxu2  ;;  %2018 = vmatpush.bf16.msrb.mxu0 %v2009_v56 }
  0xb3   : > { %v853_v1 = vadd.f32 %v848_v62, %v825_v60  ;;  %2560 = vmatmul.msk.bf16.vlgmr.msrb.gmra.mxu3 %vm664_vm1, %v1849_v57  ;;  %v2037_v47 = vsel %vm735_vm4, %v2031_v42, %v2036_v43  ;;  %v2002_v57 = vrot.slane %v3189_v58, 1  ;;  %v2091_v62 = vor.u32 %v2090_v52, %v2089_v51 }
  0xb4   : > { %2109 = vmatpush.bf16.msrb.mxu3 %v2100_v61  ;;  %v2064_v61 = vsel %vm769_vm7, %v2062_v50, %v2063_v36 }
  0xb5   : > { %v945_v18 = vpop.f32.mrf.mxu1  ;;  %v2004_v5 = vsel %vm707_vm2, %v2002_v57, %v2003_v59 }
  0xb6   : > { %v790_v9 = vpop.f32.mrf.mxu0  ;;  %v880_v10 = vpop.f32.mrf.mxu3 }
  0xb7   : > { %v794_v12 = vadd.f32 %v790_v9, %v766_v53  ;;  %v885_v13 = vadd.f32 %v880_v10, %v853_v1  ;;  %v2092_v53 = vrot.slane %v2032_v16, 2 }
  0xb8   : > { %2564 = vmatmul.msk.bf16.vlgmr.msra.gmra.mxu1 %vm664_vm1, %v1907_v11 }
  0xb9   : > { %v826_v21 = vadd.f32 %v822_v55, %v794_v12  ;;  %v2094_v63 = vor.u32 %v2093_v54, %v2092_v53 }
  0xba   : > { %v850_v3 = vpop.f32.mrf.mxu2 }
  0xbb   : > { %v854_v17 = vadd.f32 %v850_v3, %v826_v21  ;;  %v2095_v8 = vsel %vm797_vm5, %v2091_v62, %v2094_v63 }
  0xbd   : > { %v947_v35 = vpop.f32.mrf.mxu1 }
  0xbe   : > { %v882_v27 = vpop.f32.mrf.mxu3  ;;  %v918_v28 = vpop.f32.mrf.mxu0 }
  0xbf   : > { %v886_v33 = vadd.f32 %v882_v27, %v854_v17  ;;  %v923_v34 = vadd.f32 %v918_v28, %v885_v13  ;;  %2570 = vmatmul.msk.bf16.vlgmr.msra.gmra.mxu2 %vm664_vm1, %v3189_v58 }
  0xc1   : > { %v950_v39 = vadd.f32 %v945_v18, %v923_v34  ;;  %2562 = vmatmul.msk.bf16.vlgmr.msra.gmra.mxu0 %vm664_vm1, %v1880_v26 }
  0xc2   : > { %v978_v40 = vpop.f32.mrf.mxu2  ;;  %2136 = vmatpush.bf16.msra.mxu0 %v2127_v37 }
  0xc3   : > { %v983_v44 = vadd.f32 %v978_v40, %v950_v39  ;;  %2572 = vmatmul.msk.bf16.vlgmr.msra.gmra.mxu3 %vm664_vm1, %v1977_v38 }
  0xc5   : > { %v1063_v41 = vpop.f32.mrf.mxu1 }
  0xc6   : > { %v920_v45 = vpop.f32.mrf.mxu0  ;;  %v1005_v46 = vpop.f32.mrf.mxu3 }
  0xc7   : > { %v924_v48 = vadd.f32 %v920_v45, %v886_v33  ;;  %v1010_v49 = vadd.f32 %v1005_v46, %v983_v44 }
  0xc8   : > { %2576 = vmatmul.msk.bf16.vlgmr.msrb.gmra.mxu1 %vm664_vm1, %v2037_v47 }
  0xc9   : > { %v951_v55 = vadd.f32 %v947_v35, %v924_v48 }
  0xca   : > { %v980_v56 = vpop.f32.mrf.mxu2 }
  0xcb   : > { %v984_v60 = vadd.f32 %v980_v56, %v951_v55 }
  0xcd   : > { %v1065_v7 = vpop.f32.mrf.mxu1 }
  0xce   : > { %v1007_v0 = vpop.f32.mrf.mxu3  ;;  %v1036_v1 = vpop.f32.mrf.mxu0 }
  0xcf   : > { %v1011_v4 = vadd.f32 %v1007_v0, %v984_v60  ;;  %v1041_v6 = vadd.f32 %v1036_v1, %v1010_v49  ;;  %2578 = vmatmul.msk.bf16.vlgmr.msrb.gmra.mxu2 %vm664_vm1, %v2064_v61 }
  0xd1   : > { %v1068_v9 = vadd.f32 %v1063_v41, %v1041_v6  ;;  %2574 = vmatmul.msk.bf16.vlgmr.msrb.gmra.mxu0 %vm664_vm1, %v2004_v5 }
  0xd2   : > { %v1095_v10 = vpop.f32.mrf.mxu2 }
  0xd3   : > { %v1100_v11 = vadd.f32 %v1095_v10, %v1068_v9  ;;  %2580 = vmatmul.msk.bf16.vlgmr.msrb.gmra.mxu3 %vm664_vm1, %v2095_v8 }
  0xd5   : > { %v1193_v20 = vpop.f32.mrf.mxu1 }
  0xd6   : > { %v1038_v12 = vpop.f32.mrf.mxu0  ;;  %v1133_v13 = vpop.f32.mrf.mxu3 }
  0xd7   : > { %v1042_v18 = vadd.f32 %v1038_v12, %v1011_v4  ;;  %v1138_v19 = vadd.f32 %v1133_v13, %v1100_v11 }
  0xd9   : > { %v1069_v14 = vadd.f32 %v1065_v7, %v1042_v18 }
  0xda   : > { %v1097_v21 = vpop.f32.mrf.mxu2 }
  0xdb   : > { %v1101_v3 = vadd.f32 %v1097_v21, %v1069_v14 }
  0xdd   : > { %v1195_v26 = vpop.f32.mrf.mxu1 }
  0xde   : > { %v1135_v16 = vpop.f32.mrf.mxu3  ;;  %v1160_v17 = vpop.f32.mrf.mxu0 }
  0xdf   : > { %v1139_v24 = vadd.f32 %v1135_v16, %v1101_v3  ;;  %v1165_v25 = vadd.f32 %v1160_v17, %v1138_v19 }
  0xe1   : > { %2582 = vmatmul.msk.bf16.vlgmr.msra.gmra.mxu0 %vm664_vm1, %v2122_v23  ;;  %v1198_v45 = vadd.f32 %v1193_v20, %v1165_v25 }
  0xe2   : > { %v1220_v27 = vpop.f32.mrf.mxu2 }
  0xe3   : > { %v1225_v48 = vadd.f32 %v1220_v27, %v1198_v45 }
  0xe5   : > { %v1310_v31 = vpop.f32.mrf.mxu1 }
  0xe6   : > { %v1162_v28 = vpop.f32.mrf.mxu0  ;;  %v1251_v29 = vpop.f32.mrf.mxu3 }
  0xe7   : > { %v1166_v30 = vadd.f32 %v1162_v28, %v1139_v24  ;;  %v1256_v50 = vadd.f32 %v1251_v29, %v1225_v48 }
  0xe9   : > { %v1199_v41 = vadd.f32 %v1195_v26, %v1166_v30 }
  0xea   : > { %v1222_v32 = vpop.f32.mrf.mxu2 }
  0xeb   : > { %v1226_v54 = vadd.f32 %v1222_v32, %v1199_v41 }
  0xed   : > { %v1312_v34 = vpop.f32.mrf.mxu1 }
  0xee   : > { %v1253_v33 = vpop.f32.mrf.mxu3  ;;  %v1278_v58 = vpop.f32.mrf.mxu0 }
  0xef   : > { %v1283_v51 = vadd.f32 %v1278_v58, %v1256_v50  ;;  %v1257_v57 = vadd.f32 %v1253_v33, %v1226_v54 }
  0xf1   : > { %v1315_v55 = vadd.f32 %v1310_v31, %v1283_v51 }
  0xf2   : > { %v1348_v2 = vpop.f32.mrf.mxu2 }
  0xf3   : > { %v1353_v60 = vadd.f32 %v1348_v2, %v1315_v55 }
  0xf5   : > { %v1435_v38 = vpop.f32.mrf.mxu1 }
  0xf6   : > { %v1280_v35 = vpop.f32.mrf.mxu0  ;;  %v1375_v37 = vpop.f32.mrf.mxu3 }
  0xf7   : > { %v1284_v61 = vadd.f32 %v1280_v35, %v1257_v57  ;;  %v1380_v62 = vadd.f32 %v1375_v37, %v1353_v60 }
  0xf9   : > { %v1316_v1 = vadd.f32 %v1312_v34, %v1284_v61 }
  0xfa   : > { %v1350_v39 = vpop.f32.mrf.mxu2 }
  0xfb   : > { %v1354_v7 = vadd.f32 %v1350_v39, %v1316_v1 }
  0xfd   : > { %v1437_v43 = vpop.f32.mrf.mxu1 }
  0xfe   : > { %v1377_v40 = vpop.f32.mrf.mxu3  ;;  %v1408_v42 = vpop.f32.mrf.mxu0 }
  0xff   : > { %v1413_v5 = vadd.f32 %v1408_v42, %v1380_v62  ;;  %v1381_v9 = vadd.f32 %v1377_v40, %v1354_v7 }
 0x101   : > { %v1440_v8 = vadd.f32 %v1435_v38, %v1413_v5 }
 0x102   : > { %v1466_v44 = vpop.f32.mrf.mxu2 }
 0x103   : > { %v1471_v12 = vadd.f32 %v1466_v44, %v1440_v8 }
 0x105   : > { %v1563_v49 = vpop.f32.mrf.mxu1 }
 0x106   : > { %v1410_v46 = vpop.f32.mrf.mxu0  ;;  %v1493_v47 = vpop.f32.mrf.mxu3 }
 0x107   : > { %v1414_v13 = vadd.f32 %v1410_v46, %v1381_v9  ;;  %v1498_v19 = vadd.f32 %v1493_v47, %v1471_v12 }
 0x109   : > { %v1441_v14 = vadd.f32 %v1437_v43, %v1414_v13 }
 0x10a   : > { %v1468_v36 = vpop.f32.mrf.mxu2 }
 0x10b   : > { %v1472_v3 = vadd.f32 %v1468_v36, %v1441_v14 }
 0x10d   : > { %v1565_v56 = vpop.f32.mrf.mxu1 }
 0x10e   : > { %v1495_v52 = vpop.f32.mrf.mxu3  ;;  %v1525_v53 = vpop.f32.mrf.mxu0 }
 0x10f   : > { %v1530_v21 = vadd.f32 %v1525_v53, %v1498_v19  ;;  %v1499_v17 = vadd.f32 %v1495_v52, %v1472_v3 }
 0x111   : > { %v1568_v16 = vadd.f32 %v1563_v49, %v1530_v21 }
 0x112   : > { %v1590_v59 = vpop.f32.mrf.mxu2 }
 0x113   : > { %v1595_v25 = vadd.f32 %v1590_v59, %v1568_v16 }
 0x115   : > { %v1681_v4 = vpop.f32.mrf.mxu1 }
 0x116   : > { %v1527_v63 = vpop.f32.mrf.mxu0  ;;  %v1623_v0 = vpop.f32.mrf.mxu3 }
 0x117   : > { %v1531_v26 = vadd.f32 %v1527_v63, %v1499_v17  ;;  %v1628_v27 = vadd.f32 %v1623_v0, %v1595_v25 }
 0x119   : > { %v1569_v30 = vadd.f32 %v1565_v56, %v1531_v26 }
 0x11a   : > { %v1592_v6 = vpop.f32.mrf.mxu2 }
 0x11b   : > { %v1596_v33 = vadd.f32 %v1592_v6, %v1569_v30 }
 0x11d   : > { %v1683_v18 = vpop.f32.mrf.mxu1 }
 0x11e   : > { %v1625_v10 = vpop.f32.mrf.mxu3  ;;  %v1650_v11 = vpop.f32.mrf.mxu0 }
 0x11f   : > { %v1655_v31 = vadd.f32 %v1650_v11, %v1628_v27  ;;  %v1629_v2 = vadd.f32 %v1625_v10, %v1596_v33 }
 0x121   : > { %v1686_v58 = vadd.f32 %v1681_v4, %v1655_v31 }
 0x122   : > { %v1708_v20 = vpop.f32.mrf.mxu2 }
 0x123   : > { %v1713_v38 = vadd.f32 %v1708_v20, %v1686_v58 }
 0x125   : > { %v1805_v23 = vpop.f32.mrf.mxu1 }
 0x126   : > { %v1652_v15 = vpop.f32.mrf.mxu0  ;;  %v1740_v22 = vpop.f32.mrf.mxu3 }
 0x127   : > { %v1656_v39 = vadd.f32 %v1652_v15, %v1629_v2  ;;  %v1745_v40 = vadd.f32 %v1740_v22, %v1713_v38 }
 0x129   : > { %v1687_v43 = vadd.f32 %v1683_v18, %v1656_v39 }
 0x12a   : > { %v1710_v24 = vpop.f32.mrf.mxu2 }
 0x12b   : > { %v1714_v48 = vadd.f32 %v1710_v24, %v1687_v43 }
 0x12d   : > { %v1807_v34 = vpop.f32.mrf.mxu1 }
 0x12e   : > { %v1742_v28 = vpop.f32.mrf.mxu3  ;;  %v1778_v29 = vpop.f32.mrf.mxu0 }
 0x12f   : > { %v1783_v44 = vadd.f32 %v1778_v29, %v1745_v40  ;;  %v1746_v50 = vadd.f32 %v1742_v28, %v1714_v48 }
 0x131   : > { %v1810_v49 = vadd.f32 %v1805_v23, %v1783_v44 }
 0x132   : > { %v1838_v32 = vpop.f32.mrf.mxu2 }
 0x133   : > { %v1843_v41 = vadd.f32 %v1838_v32, %v1810_v49 }
 0x135   : > { %v1923_v45 = vpop.f32.mrf.mxu1 }
 0x136   : > { %v1780_v35 = vpop.f32.mrf.mxu0  ;;  %v1865_v37 = vpop.f32.mrf.mxu3 }
 0x137   : > { %v1784_v51 = vadd.f32 %v1780_v35, %v1746_v50  ;;  %v1870_v52 = vadd.f32 %v1865_v37, %v1843_v41 }
 0x139   : > { %v1811_v55 = vadd.f32 %v1807_v34, %v1784_v51 }
 0x13a   : > { %v1840_v42 = vpop.f32.mrf.mxu2 }
 0x13b   : > { %v1844_v59 = vadd.f32 %v1840_v42, %v1811_v55 }
 0x13d   : > { %v1925_v57 = vpop.f32.mrf.mxu1 }
 0x13e   : > { %v1867_v46 = vpop.f32.mrf.mxu3  ;;  %v1896_v47 = vpop.f32.mrf.mxu0 }
 0x13f   : > { %v1901_v56 = vadd.f32 %v1896_v47, %v1870_v52  ;;  %v1871_v62 = vadd.f32 %v1867_v46, %v1844_v59 }
 0x141   : > { %v1928_v60 = vadd.f32 %v1923_v45, %v1901_v56 }
 0x142   : > { %v1955_v36 = vpop.f32.mrf.mxu2 }
 0x143   : > { %v1960_v1 = vadd.f32 %v1955_v36, %v1928_v60 }
 0x145   : > { %v2053_v6 = vpop.f32.mrf.mxu1 }
 0x146   : > { %v1898_v53 = vpop.f32.mrf.mxu0  ;;  %v1993_v54 = vpop.f32.mrf.mxu3 }
 0x147   : > { %v1902_v5 = vadd.f32 %v1898_v53, %v1871_v62  ;;  %v1998_v4 = vadd.f32 %v1993_v54, %v1960_v1 }
 0x149   : > { %v1929_v7 = vadd.f32 %v1925_v57, %v1902_v5 }
 0x14a   : > { %v1957_v61 = vpop.f32.mrf.mxu2 }
 0x14b   : > { %v1961_v11 = vadd.f32 %v1957_v61, %v1929_v7 }
 0x14d   : > { %v2055_v14 = vpop.f32.mrf.mxu1 }
 0x14e   : > { %v1995_v63 = vpop.f32.mrf.mxu3  ;;  %v2020_v0 = vpop.f32.mrf.mxu0 }
 0x14f   : > { %v2025_v8 = vadd.f32 %v2020_v0, %v1998_v4  ;;  %v1999_v18 = vadd.f32 %v1995_v63, %v1961_v11 }
 0x151   : > { %v2058_v12 = vadd.f32 %v2053_v6, %v2025_v8 }
 0x152   : > { %v2080_v9 = vpop.f32.mrf.mxu2 }
 0x153   : > { %v2085_v19 = vadd.f32 %v2080_v9, %v2058_v12 }
 0x156   : > { %v2022_v10 = vpop.f32.mrf.mxu0  ;;  %v2111_v13 = vpop.f32.mrf.mxu3 }
 0x157   : > { %v2026_v20 = vadd.f32 %v2022_v10, %v1999_v18  ;;  %v2116_v21 = vadd.f32 %v2111_v13, %v2085_v19 }
 0x159   : > { %v2059_v22 = vadd.f32 %v2055_v14, %v2026_v20 }
 0x15a   : > { %v2082_v16 = vpop.f32.mrf.mxu2 }
 0x15b   : > { %v2086_v24 = vadd.f32 %v2082_v16, %v2059_v22 }
 0x15e   : > { %v2138_v15 = vpop.f32.mrf.mxu0  ;;  %v2113_v23 = vpop.f32.mrf.mxu3 }
 0x15f   : > { %v2143_v3 = vadd.f32 %v2138_v15, %v2116_v21  ;;  %v2117_v25 = vadd.f32 %v2113_v23, %v2086_v24 }
 0x161   : > { %v2145_v17 = vpack.c.bf16 %v2143_v3, %v2143_v3  ;;  %v2161_v27 = vmul.f32 %v2143_v3, %v2143_v3  ;;  %v2150_v29 = vsel %vm664_vm1, %v2143_v3, 0.0 }
 0x163   : > { %2148 = vst.msk [vmem:[%s627_s24] sm:$0xf] %vm2147_vm8, %v2145_v17  ;;  %v2163_v58 = vsel %vm664_vm1, %v2161_v27, 0.0 }
 0x166   : > { %v2140_v26 = vpop.f32.mrf.mxu0 }
 0x167   : > { %v2144_v28 = vadd.f32 %v2140_v26, %v2117_v25 }
 0x169   : > { %v2146_v30 = vpack.c.bf16 %v2144_v28, %v2144_v28  ;;  %v2151_v31 = vsel %vm664_vm1, %v2144_v28, 0.0  ;;  %v2162_v32 = vmul.f32 %v2144_v28, %v2144_v28 }
 0x16a   : > { %v2152_v33 = vadd.f32 %v2151_v31, %v2150_v29 }
 0x16b   : > { %2149 = vst.msk [vmem:[%s627_s24 + $0x4] sm:$0xf] %vm2147_vm8, %v2146_v30  ;;  %v2164_v34 = vsel %vm664_vm1, %v2162_v32, 0.0 }
 0x16c   : > { %v2153_v2 = vrot.slane %v2152_v33, 4  ;;  %v2165_v35 = vadd.f32 %v2164_v34, %v2163_v58 }
 0x16e   : > { %v2154_v37 = vadd.f32 %v2153_v2, %v2152_v33  ;;  %v2166_v38 = vrot.slane %v2165_v35, 4 }
 0x170   : > { %v2155_v39 = vrot.slane %v2154_v37, 2  ;;  %v2167_v40 = vadd.f32 %v2166_v38, %v2165_v35 }
 0x172   : > { %v2156_v42 = vadd.f32 %v2155_v39, %v2154_v37  ;;  %v2168_v43 = vrot.slane %v2167_v40, 2 }
 0x174   : > { %v2157_v44 = vrot.slane %v2156_v42, 1  ;;  %v2169_v45 = vadd.f32 %v2168_v43, %v2167_v40 }
 0x176   : > { %v2158_v46 = vadd.f32 %v2157_v44, %v2156_v42  ;;  %v2170_v47 = vrot.slane %v2169_v45, 1 }
 0x178   : > { %2160 = vst.msk [vmem:[%s635_s17] sm:$0x1] %vm2159_vm9, %v2158_v46  ;;  %v2171_v48 = vadd.f32 %v2170_v47, %v2169_v45 }
 0x17a   : > { %2172 = vst.msk [vmem:[%s635_s17 + $0x1] sm:$0x1] %vm2159_vm9, %v2171_v48 }
 0x17b PF: > { %s20_s13 = sadd.s32 1, %s2678_s13   ;;  %s3283_s30 = smov %s2670_s11 }
 0x17c   : > { %p17_p0 = scmp.ge.s32.totalorder %s20_s13, 34   ;;  %s3284_s10 = smov %s2674_s12 }
 0x17d   : > { %s3285_s11 = smov %s3288_s14  ;;  %s3286_s12 = smov %s3292_s15 }
 0x17e   :  { %19 = sbr.rel (!%p17_p0) target bundleno = 3 (0x3), region = 160 }

</bundles_post_ra>
